<compile_context>
chip_gen: v7x
topology: tpu7x:2x2x1
jax: 0.10.0
libtpu: 0.0.40
codegen_flags: <defaults>
</compile_context>

<pallas_src>
import functools

import jax
import jax.numpy as jnp
import numpy as np
from jax.experimental import pallas as pl
from jax.experimental.pallas import tpu as pltpu


def cab_kernel(xh_ref, xl_ref, w0_ref, b0_ref, w1h_ref, w1l_ref, b1_ref,
               w2_ref, b2_ref, o_ref, *, bg, hw):
    """One grid step: a group of `bg` batch elements, spatial axis = lanes.

    xh_ref: (Ch, bg*hw) bf16     xl_ref: (Cl, bg*hw) bf16
    w0_ref: (Ch, Cl)    bf16 (BatchNorm folded)        b0_ref: (Ch, 1) f32
    w1h/w1l: fc1 weight split over the [x_h | x_l] channel concat (f32)
    o_ref:  (bg, Ch, hw) f32
    """
    f32 = jnp.float32
    inv_hw = 1.0 / hw

    # ---- 1) Global avg/max pooling per batch element (f32 accumulation) ----
    # Pools only need xh/xl, so they run *before* conv0; the big f32 conv0
    # temp is therefore not live across the squeeze-excite path.
    avg_h, max_h, avg_l, max_l = [], [], [], []
    for bt in range(bg):
        sl = slice(bt * hw, (bt + 1) * hw)          # static, 128-aligned slice
        xhf = xh_ref[:, sl].astype(f32)             # (Ch, hw)
        xlf = xl_ref[:, sl].astype(f32)             # (Cl, hw)
        avg_h.append(jnp.sum(xhf, axis=1, keepdims=True) * inv_hw)
        max_h.append(jnp.max(xhf, axis=1, keepdims=True))
        avg_l.append(jnp.sum(xlf, axis=1, keepdims=True) * inv_hw)
        max_l.append(jnp.max(xlf, axis=1, keepdims=True))
    pool_h = jnp.concatenate(avg_h + max_h, axis=1)  # (Ch, 2*bg): [avg | max] cols
    pool_l = jnp.concatenate(avg_l + max_l, axis=1)  # (Cl, 2*bg)

    # ---- 2) Squeeze-excite: both branches and all bg batches share one
    #         fc1 / fc2 matmul pair (channel-concat handled by the w1 split).
    h = (jnp.dot(w1h_ref[...], pool_h, preferred_element_type=f32)
         + jnp.dot(w1l_ref[...], pool_l, preferred_element_type=f32)
         + b1_ref[...])                                              # (Cmid, 2*bg)
    h = jnp.maximum(h, 0.0)                                          # ReLU
    z = jnp.dot(w2_ref[...], h, preferred_element_type=f32)          # (Ch, 2*bg)
    # avg_out + max_out = z_avg + z_max + 2*b2 (fc2 bias appears in both branches)
    att = jax.nn.sigmoid(z[:, :bg] + z[:, bg:] + 2.0 * b2_ref[...])  # (Ch, bg)

    # ---- 3) conv0 (1x1, BN folded) in bf16 on the whole batch group,
    #         LeakyReLU(0.1), then xh + att * x_l_1 streamed to the output.
    y = jnp.dot(w0_ref[...], xl_ref[...], preferred_element_type=f32) + b0_ref[...]
    y = jnp.where(y > 0, y, 0.1 * y)                 # (Ch, bg*hw) f32, LeakyReLU(0.1)
    for bt in range(bg):
        sl = slice(bt * hw, (bt + 1) * hw)
        o_ref[bt] = xh_ref[:, sl].astype(f32) + att[:, bt:bt + 1] * y[:, sl]


def _pick_batch_group(B, HW, Ch, Cl, vmem_budget_bytes=24 * 1024 * 1024):
    """Largest batch group that (a) divides B, (b) fits a VMEM budget, and
    (c) still leaves >=2 grid steps when possible (v7x megacore)."""
    per_batch = HW * (2 * 2 * (Ch + Cl)    # bf16 xh + xl, double-buffered
                      + 2 * 4 * Ch         # f32 output block, double-buffered
                      + 4 * Ch)            # f32 conv0 / LeakyReLU temp
    candidates = [d for d in range(1, B + 1)
                  if B % d == 0 and d * per_batch <= vmem_budget_bytes]
    if not candidates:
        return 1
    two_steps = [d for d in candidates if B // d >= 2]
    return max(two_steps) if two_steps else max(candidates)


def cab_forward(x_h_nchw, x_l_nchw, params):
    B, Ch, H, W = x_h_nchw.shape
    _, Cl, _, _ = x_l_nchw.shape
    HW = H * W
    (w0, b0, g, be, mu, var, w1, b1, w2, b2) = params
    Cmid = w1.shape[0]

    # Fold eval-mode BatchNorm into conv0 in f32, then cast the weight to bf16
    # for the MXU.  TODO(synk): training-mode BN (batch statistics) is not
    # implemented; eval-mode running stats assumed.
    scale = g * jax.lax.rsqrt(var + 1e-5)                       # (Ch,)
    w0f = (w0 * scale[:, None]).astype(jnp.bfloat16)            # (Ch, Cl) bf16
    b0f = ((b0 - mu) * scale + be).reshape(Ch, 1).astype(jnp.float32)

    # Split fc1's weight over the channel-concat [x_h | x_l].
    w1h = jnp.asarray(w1[:, :Ch], jnp.float32)                  # (Cmid, Ch)
    w1l = jnp.asarray(w1[:, Ch:], jnp.float32)                  # (Cmid, Cl)
    b1c = b1.reshape(Cmid, 1).astype(jnp.float32)
    w2f = jnp.asarray(w2, jnp.float32)                          # (Ch, Cmid)
    b2c = b2.reshape(Ch, 1).astype(jnp.float32)

    # Channels-leading, batch-folded-into-lanes layout: (C, B*HW) in bf16.
    # The transpose rides along the f32->bf16 cast pass (one fused copy); in a
    # real model, produce activations directly in this layout / dtype to avoid
    # any extra HBM round trip.
    xh2 = jnp.transpose(x_h_nchw, (1, 0, 2, 3)).reshape(Ch, B * HW).astype(jnp.bfloat16)
    xl2 = jnp.transpose(x_l_nchw, (1, 0, 2, 3)).reshape(Cl, B * HW).astype(jnp.bfloat16)

    bg = _pick_batch_group(B, HW, Ch, Cl)
    if HW % 128 != 0:
        bg = B  # full-array lane block sidesteps the 128-divisibility rule
    grid = (B // bg,)

    flops = (2 * B * HW * Cl * Ch                              # conv0
             + 4 * B * (Cmid * (Ch + Cl) + Ch * Cmid)          # SE (avg+max branches)
             + 6 * B * HW * Ch)                                # elementwise tail
    bytes_accessed = 2 * B * HW * (Ch + Cl) + 4 * B * HW * Ch  # bf16 in, f32 out

    kernel = functools.partial(cab_kernel, bg=bg, hw=HW)

    out = pl.pallas_call(
        kernel,
        out_shape=jax.ShapeDtypeStruct((B, Ch, HW), jnp.float32),
        grid_spec=pltpu.PrefetchScalarGridSpec(
            num_scalar_prefetch=0,
            grid=grid,
            in_specs=[
                pl.BlockSpec((Ch, bg * HW), lambda i: (0, i)),    # x_h  (bf16)
                pl.BlockSpec((Cl, bg * HW), lambda i: (0, i)),    # x_l  (bf16)
                pl.BlockSpec((Ch, Cl), lambda i: (0, 0)),         # conv0 weight (BN folded, bf16)
                pl.BlockSpec((Ch, 1), lambda i: (0, 0)),          # conv0 bias   (BN folded)
                pl.BlockSpec((Cmid, Ch), lambda i: (0, 0)),       # fc1 weight, x_h half
                pl.BlockSpec((Cmid, Cl), lambda i: (0, 0)),       # fc1 weight, x_l half
                pl.BlockSpec((Cmid, 1), lambda i: (0, 0)),        # fc1 bias
                pl.BlockSpec((Ch, Cmid), lambda i: (0, 0)),       # fc2 weight
                pl.BlockSpec((Ch, 1), lambda i: (0, 0)),          # fc2 bias
            ],
            out_specs=pl.BlockSpec((bg, Ch, HW), lambda i: (i, 0, 0)),
        ),
        compiler_params=pltpu.CompilerParams(
            dimension_semantics=("parallel",),
            # Raise the scoped VMEM limit (v5e default is only 16 MiB) so the
            # compiler keeps the big lane-dense blocks; still <= v7x physical.
            vmem_limit_bytes=64 * 1024 * 1024,
        ),
        cost_estimate=pl.CostEstimate(flops=flops, transcendentals=B * Ch,
                                      bytes_accessed=bytes_accessed),
    )(xh2, xl2, w0f, b0f, w1h, w1l, b1c, w2f, b2c)

    return out.reshape(B, Ch, H, W)  # (B, Ch, HW) is already NCHW-contiguous


def init_params(key, high_channels, low_channels):
    """Deterministic, PyTorch-layout-ish parameters (BN in eval mode)."""
    cat = high_channels + low_channels
    cmid = cat // 16
    ks = jax.random.split(key, 10)
    w0 = 0.1 * jax.random.normal(ks[0], (high_channels, low_channels), jnp.float32)
    b0 = 0.1 * jax.random.normal(ks[1], (high_channels,), jnp.float32)
    gamma = 1.0 + 0.1 * jax.random.normal(ks[2], (high_channels,), jnp.float32)
    beta = 0.1 * jax.random.normal(ks[3], (high_channels,), jnp.float32)
    run_mean = 0.1 * jax.random.normal(ks[4], (high_channels,), jnp.float32)
    run_var = jnp.abs(1.0 + 0.1 * jax.random.normal(ks[5], (high_channels,), jnp.float32))
    w1 = 0.1 * jax.random.normal(ks[6], (cmid, cat), jnp.float32)     # fc1 (out, in)
    b1 = 0.1 * jax.random.normal(ks[7], (cmid,), jnp.float32)
    w2 = 0.1 * jax.random.normal(ks[8], (high_channels, cmid), jnp.float32)  # fc2 (out, in)
    b2 = 0.1 * jax.random.normal(ks[9], (high_channels,), jnp.float32)
    return (w0, b0, gamma, beta, run_mean, run_var, w1, b1, w2, b2)


def cab_reference(x_h, x_l, params):
    """Pure-JAX f32 reference mirroring the PyTorch forward (BN eval mode), NCHW."""
    (w0, b0, g, be, mu, var, w1, b1, w2, b2) = params
    y = jnp.einsum('oc,bchw->bohw', w0, x_l) + b0[None, :, None, None]
    y = ((y - mu[None, :, None, None]) * jax.lax.rsqrt(var + 1e-5)[None, :, None, None]
         * g[None, :, None, None] + be[None, :, None, None])
    xl1 = jnp.where(y > 0, y, 0.1 * y)               # LeakyReLU(0.1), per ABN default
    cat = jnp.concatenate([x_h, x_l], axis=1)
    avg = cat.mean(axis=(2, 3))   # (B, cat)
    mx = cat.max(axis=(2, 3))     # (B, cat)

    def se(p):
        h = jnp.maximum(p @ w1.T + b1, 0.0)
        return h @ w2.T + b2

    att = jax.nn.sigmoid(se(avg) + se(mx))           # (B, Ch)
    return x_h + att[:, :, None, None] * xl1


if __name__ == "__main__":
    B, HIGH, LOW, H, W = 4, 32, 32, 16, 16  # cat = 64, cat//16 = 4, HW = 256

    key = jax.random.PRNGKey(0)
    k_h, k_l, k_p = jax.random.split(key, 3)
    x_h = jax.random.normal(k_h, (B, HIGH, H, W), jnp.float32)  # NCHW like PyTorch
    x_l = jax.random.normal(k_l, (B, LOW, H, W), jnp.float32)
    # The kernel streams activations as bf16; pre-round the test inputs so the
    # f32 reference sees the same values and the check isolates kernel error.
    x_h = x_h.astype(jnp.bfloat16).astype(jnp.float32)
    x_l = x_l.astype(jnp.bfloat16).astype(jnp.float32)
    params = init_params(k_p, HIGH, LOW)

    out = jax.block_until_ready(cab_forward(x_h, x_l, params))

    ref = jax.block_until_ready(cab_reference(x_h, x_l, params))
    # bf16 matmul weights -> relaxed tolerance (was 2e-5 with an all-f32 path).
    np.testing.assert_allclose(np.asarray(out), np.asarray(ref), rtol=2e-2, atol=2e-2)

    assert out.shape == (B, HIGH, H, W)
    print("KERNEL_OK")
</pallas_src>

<mosaic_0001>
module attributes {stable_mosaic.version = 11 : i64} {
  func.func @cab_kernel(%arg0: i32, %arg1: memref<32x512xbf16, #tpu.memory_space<vmem>>, %arg2: memref<32x512xbf16, #tpu.memory_space<vmem>>, %arg3: memref<32x32xbf16, #tpu.memory_space<vmem>>, %arg4: memref<32x1xf32, #tpu.memory_space<vmem>>, %arg5: memref<4x32xf32, #tpu.memory_space<vmem>>, %arg6: memref<4x32xf32, #tpu.memory_space<vmem>>, %arg7: memref<4x1xf32, #tpu.memory_space<vmem>>, %arg8: memref<32x4xf32, #tpu.memory_space<vmem>>, %arg9: memref<32x1xf32, #tpu.memory_space<vmem>>, %arg10: memref<2x32x256xf32, #tpu.memory_space<vmem>>) attributes {dimension_semantics = [#tpu.dimension_semantics<parallel>], iteration_bounds = array<i64: 2>, scalar_prefetch = 0 : i64, scratch_operands = 0 : i64, tpu.core_type = #tpu.core_type<tc>, window_params = [{transform_indices = @transform_0, window_bounds = array<i64: 32, 512>}, {transform_indices = @transform_1, window_bounds = array<i64: 32, 512>}, {pipeline_mode = #tpu.pipeline_mode<synchronous>, transform_indices = @transform_2, window_bounds = array<i64: 32, 32>}, {pipeline_mode = #tpu.pipeline_mode<synchronous>, transform_indices = @transform_3, window_bounds = array<i64: 32, 1>}, {pipeline_mode = #tpu.pipeline_mode<synchronous>, transform_indices = @transform_4, window_bounds = array<i64: 4, 32>}, {pipeline_mode = #tpu.pipeline_mode<synchronous>, transform_indices = @transform_5, window_bounds = array<i64: 4, 32>}, {pipeline_mode = #tpu.pipeline_mode<synchronous>, transform_indices = @transform_6, window_bounds = array<i64: 4, 1>}, {pipeline_mode = #tpu.pipeline_mode<synchronous>, transform_indices = @transform_7, window_bounds = array<i64: 32, 4>}, {pipeline_mode = #tpu.pipeline_mode<synchronous>, transform_indices = @transform_8, window_bounds = array<i64: 32, 1>}, {transform_indices = @transform_9, window_bounds = array<i64: 2, 32, 256>}]} {
    %c0 = arith.constant 0 : index
    %c0_0 = arith.constant 0 : index
    %0 = vector.load %arg1[%c0, %c0_0] : memref<32x512xbf16, #tpu.memory_space<vmem>>, vector<32x256xbf16>
    %1 = arith.extf %0 : vector<32x256xbf16> to vector<32x256xf32>
    %c0_1 = arith.constant 0 : index
    %c0_2 = arith.constant 0 : index
    %2 = vector.load %arg2[%c0_1, %c0_2] : memref<32x512xbf16, #tpu.memory_space<vmem>>, vector<32x256xbf16>
    %3 = arith.extf %2 : vector<32x256xbf16> to vector<32x256xf32>
    %cst = arith.constant dense<0.000000e+00> : vector<32xf32>
    %4 = vector.multi_reduction <add>, %1, %cst [1] : vector<32x256xf32> to vector<32xf32>
    %5 = vector.shape_cast %4 : vector<32xf32> to vector<32x1xf32>
    %cst_3 = arith.constant 3.906250e-03 : f32
    %6 = vector.broadcast %cst_3 : f32 to vector<32x1xf32>
    %7 = arith.mulf %5, %6 : vector<32x1xf32>
    %cst_4 = arith.constant dense<0xFF800000> : vector<32xf32>
    %8 = vector.multi_reduction <maximumf>, %1, %cst_4 [1] : vector<32x256xf32> to vector<32xf32>
    %9 = vector.shape_cast %8 : vector<32xf32> to vector<32x1xf32>
    %cst_5 = arith.constant dense<0.000000e+00> : vector<32xf32>
    %10 = vector.multi_reduction <add>, %3, %cst_5 [1] : vector<32x256xf32> to vector<32xf32>
    %11 = vector.shape_cast %10 : vector<32xf32> to vector<32x1xf32>
    %cst_6 = arith.constant 3.906250e-03 : f32
    %12 = vector.broadcast %cst_6 : f32 to vector<32x1xf32>
    %13 = arith.mulf %11, %12 : vector<32x1xf32>
    %cst_7 = arith.constant dense<0xFF800000> : vector<32xf32>
    %14 = vector.multi_reduction <maximumf>, %3, %cst_7 [1] : vector<32x256xf32> to vector<32xf32>
    %15 = vector.shape_cast %14 : vector<32xf32> to vector<32x1xf32>
    %c0_8 = arith.constant 0 : index
    %c256 = arith.constant 256 : index
    %16 = vector.load %arg1[%c0_8, %c256] : memref<32x512xbf16, #tpu.memory_space<vmem>>, vector<32x256xbf16>
    %17 = arith.extf %16 : vector<32x256xbf16> to vector<32x256xf32>
    %c0_9 = arith.constant 0 : index
    %c256_10 = arith.constant 256 : index
    %18 = vector.load %arg2[%c0_9, %c256_10] : memref<32x512xbf16, #tpu.memory_space<vmem>>, vector<32x256xbf16>
    %19 = arith.extf %18 : vector<32x256xbf16> to vector<32x256xf32>
    %cst_11 = arith.constant dense<0.000000e+00> : vector<32xf32>
    %20 = vector.multi_reduction <add>, %17, %cst_11 [1] : vector<32x256xf32> to vector<32xf32>
    %21 = vector.shape_cast %20 : vector<32xf32> to vector<32x1xf32>
    %cst_12 = arith.constant 3.906250e-03 : f32
    %22 = vector.broadcast %cst_12 : f32 to vector<32x1xf32>
    %23 = arith.mulf %21, %22 : vector<32x1xf32>
    %cst_13 = arith.constant dense<0xFF800000> : vector<32xf32>
    %24 = vector.multi_reduction <maximumf>, %17, %cst_13 [1] : vector<32x256xf32> to vector<32xf32>
    %25 = vector.shape_cast %24 : vector<32xf32> to vector<32x1xf32>
    %cst_14 = arith.constant dense<0.000000e+00> : vector<32xf32>
    %26 = vector.multi_reduction <add>, %19, %cst_14 [1] : vector<32x256xf32> to vector<32xf32>
    %27 = vector.shape_cast %26 : vector<32xf32> to vector<32x1xf32>
    %cst_15 = arith.constant 3.906250e-03 : f32
    %28 = vector.broadcast %cst_15 : f32 to vector<32x1xf32>
    %29 = arith.mulf %27, %28 : vector<32x1xf32>
    %cst_16 = arith.constant dense<0xFF800000> : vector<32xf32>
    %30 = vector.multi_reduction <maximumf>, %19, %cst_16 [1] : vector<32x256xf32> to vector<32xf32>
    %31 = vector.shape_cast %30 : vector<32xf32> to vector<32x1xf32>
    %32 = tpu.concatenate %7, %23, %9, %25 in 1 : vector<32x1xf32>, vector<32x1xf32>, vector<32x1xf32>, vector<32x1xf32> -> vector<32x4xf32>
    %33 = tpu.concatenate %13, %29, %15, %31 in 1 : vector<32x1xf32>, vector<32x1xf32>, vector<32x1xf32>, vector<32x1xf32> -> vector<32x4xf32>
    %c0_17 = arith.constant 0 : index
    %c0_18 = arith.constant 0 : index
    %34 = vector.load %arg5[%c0_17, %c0_18] : memref<4x32xf32, #tpu.memory_space<vmem>>, vector<4x32xf32>
    %cst_19 = arith.constant dense<0.000000e+00> : vector<4x4xf32>
    %35 = tpu.matmul %34, %32, %cst_19 {dimension_numbers = #tpu.dot_dimension_numbers<[1], [0], [0], [1], [0, 0, 1, 1], [], []>} : vector<4x32xf32>, vector<32x4xf32>, vector<4x4xf32> -> vector<4x4xf32>
    %c0_20 = arith.constant 0 : index
    %c0_21 = arith.constant 0 : index
    %36 = vector.load %arg6[%c0_20, %c0_21] : memref<4x32xf32, #tpu.memory_space<vmem>>, vector<4x32xf32>
    %cst_22 = arith.constant dense<0.000000e+00> : vector<4x4xf32>
    %37 = tpu.matmul %36, %33, %cst_22 {dimension_numbers = #tpu.dot_dimension_numbers<[1], [0], [0], [1], [0, 0, 1, 1], [], []>} : vector<4x32xf32>, vector<32x4xf32>, vector<4x4xf32> -> vector<4x4xf32>
    %38 = arith.addf %35, %37 : vector<4x4xf32>
    %c0_23 = arith.constant 0 : index
    %c0_24 = arith.constant 0 : index
    %39 = vector.load %arg7[%c0_23, %c0_24] : memref<4x1xf32, #tpu.memory_space<vmem>>, vector<4x1xf32>
    %40 = vector.broadcast %39 : vector<4x1xf32> to vector<4x4xf32>
    %41 = arith.addf %38, %40 : vector<4x4xf32>
    %cst_25 = arith.constant 0.000000e+00 : f32
    %42 = vector.broadcast %cst_25 : f32 to vector<4x4xf32>
    %43 = arith.maximumf %41, %42 : vector<4x4xf32>
    %c0_26 = arith.constant 0 : index
    %c0_27 = arith.constant 0 : index
    %44 = vector.load %arg8[%c0_26, %c0_27] : memref<32x4xf32, #tpu.memory_space<vmem>>, vector<32x4xf32>
    %cst_28 = arith.constant dense<0.000000e+00> : vector<32x4xf32>
    %45 = tpu.matmul %44, %43, %cst_28 {dimension_numbers = #tpu.dot_dimension_numbers<[1], [0], [0], [1], [0, 0, 1, 1], [], []>} : vector<32x4xf32>, vector<4x4xf32>, vector<32x4xf32> -> vector<32x4xf32>
    %46 = vector.extract_strided_slice %45 {offsets = [0, 0], sizes = [32, 2], strides = [1, 1]} : vector<32x4xf32> to vector<32x2xf32>
    %47 = vector.extract_strided_slice %45 {offsets = [0, 2], sizes = [32, 2], strides = [1, 1]} : vector<32x4xf32> to vector<32x2xf32>
    %48 = arith.addf %46, %47 : vector<32x2xf32>
    %c0_29 = arith.constant 0 : index
    %c0_30 = arith.constant 0 : index
    %49 = vector.load %arg9[%c0_29, %c0_30] : memref<32x1xf32, #tpu.memory_space<vmem>>, vector<32x1xf32>
    %cst_31 = arith.constant 2.000000e+00 : f32
    %50 = vector.broadcast %cst_31 : f32 to vector<32x1xf32>
    %51 = arith.mulf %50, %49 : vector<32x1xf32>
    %52 = vector.broadcast %51 : vector<32x1xf32> to vector<32x2xf32>
    %53 = arith.addf %48, %52 : vector<32x2xf32>
    %54 = arith.negf %53 : vector<32x2xf32>
    %55 = math.exp %54 : vector<32x2xf32>
    %cst_32 = arith.constant 1.000000e+00 : f32
    %56 = vector.broadcast %cst_32 : f32 to vector<32x2xf32>
    %57 = arith.addf %56, %55 : vector<32x2xf32>
    %58 = arith.divf %56, %57 : vector<32x2xf32>
    %c0_33 = arith.constant 0 : index
    %c0_34 = arith.constant 0 : index
    %59 = vector.load %arg3[%c0_33, %c0_34] : memref<32x32xbf16, #tpu.memory_space<vmem>>, vector<32x32xbf16>
    %c0_35 = arith.constant 0 : index
    %c0_36 = arith.constant 0 : index
    %60 = vector.load %arg2[%c0_35, %c0_36] : memref<32x512xbf16, #tpu.memory_space<vmem>>, vector<32x512xbf16>
    %cst_37 = arith.constant dense<0.000000e+00> : vector<32x512xf32>
    %61 = tpu.matmul %59, %60, %cst_37 {dimension_numbers = #tpu.dot_dimension_numbers<[1], [0], [0], [1], [0, 0, 1, 1], [], []>} : vector<32x32xbf16>, vector<32x512xbf16>, vector<32x512xf32> -> vector<32x512xf32>
    %c0_38 = arith.constant 0 : index
    %c0_39 = arith.constant 0 : index
    %62 = vector.load %arg4[%c0_38, %c0_39] : memref<32x1xf32, #tpu.memory_space<vmem>>, vector<32x1xf32>
    %63 = vector.broadcast %62 : vector<32x1xf32> to vector<32x512xf32>
    %64 = arith.addf %61, %63 : vector<32x512xf32>
    %cst_40 = arith.constant 0.000000e+00 : f32
    %65 = vector.broadcast %cst_40 : f32 to vector<32x512xf32>
    %66 = arith.cmpf ogt, %64, %65 : vector<32x512xf32>
    %cst_41 = arith.constant 1.000000e-01 : f32
    %67 = vector.broadcast %cst_41 : f32 to vector<32x512xf32>
    %68 = arith.mulf %67, %64 : vector<32x512xf32>
    %69 = arith.select %66, %64, %68 : vector<32x512xi1>, vector<32x512xf32>
    %c0_42 = arith.constant 0 : index
    %c0_43 = arith.constant 0 : index
    %70 = vector.load %arg1[%c0_42, %c0_43] : memref<32x512xbf16, #tpu.memory_space<vmem>>, vector<32x256xbf16>
    %71 = arith.extf %70 : vector<32x256xbf16> to vector<32x256xf32>
    %72 = vector.extract_strided_slice %58 {offsets = [0, 0], sizes = [32, 1], strides = [1, 1]} : vector<32x2xf32> to vector<32x1xf32>
    %73 = vector.extract_strided_slice %69 {offsets = [0, 0], sizes = [32, 256], strides = [1, 1]} : vector<32x512xf32> to vector<32x256xf32>
    %74 = vector.broadcast %72 : vector<32x1xf32> to vector<32x256xf32>
    %75 = arith.mulf %74, %73 : vector<32x256xf32>
    %76 = arith.addf %71, %75 : vector<32x256xf32>
    %c0_44 = arith.constant 0 : index
    %c0_45 = arith.constant 0 : index
    %c0_46 = arith.constant 0 : index
    %77 = vector.load %arg10[%c0_44, %c0_45, %c0_46] : memref<2x32x256xf32, #tpu.memory_space<vmem>>, vector<1x32x256xf32>
    %78 = vector.shape_cast %77 : vector<1x32x256xf32> to vector<32x256xf32>
    %79 = vector.shape_cast %76 : vector<32x256xf32> to vector<1x32x256xf32>
    tpu.vector_store %arg10[%c0_44, %c0_45, %c0_46], %79 {strides = array<i32>} : memref<2x32x256xf32, #tpu.memory_space<vmem>>, vector<1x32x256xf32>,
    %c0_47 = arith.constant 0 : index
    %c256_48 = arith.constant 256 : index
    %80 = vector.load %arg1[%c0_47, %c256_48] : memref<32x512xbf16, #tpu.memory_space<vmem>>, vector<32x256xbf16>
    %81 = arith.extf %80 : vector<32x256xbf16> to vector<32x256xf32>
    %82 = vector.extract_strided_slice %58 {offsets = [0, 1], sizes = [32, 1], strides = [1, 1]} : vector<32x2xf32> to vector<32x1xf32>
    %83 = vector.extract_strided_slice %69 {offsets = [0, 256], sizes = [32, 256], strides = [1, 1]} : vector<32x512xf32> to vector<32x256xf32>
    %84 = vector.broadcast %82 : vector<32x1xf32> to vector<32x256xf32>
    %85 = arith.mulf %84, %83 : vector<32x256xf32>
    %86 = arith.addf %81, %85 : vector<32x256xf32>
    %c1 = arith.constant 1 : index
    %c0_49 = arith.constant 0 : index
    %c0_50 = arith.constant 0 : index
    %87 = vector.load %arg10[%c1, %c0_49, %c0_50] : memref<2x32x256xf32, #tpu.memory_space<vmem>>, vector<1x32x256xf32>
    %88 = vector.shape_cast %87 : vector<1x32x256xf32> to vector<32x256xf32>
    %89 = vector.shape_cast %86 : vector<32x256xf32> to vector<1x32x256xf32>
    tpu.vector_store %arg10[%c1, %c0_49, %c0_50], %89 {strides = array<i32>} : memref<2x32x256xf32, #tpu.memory_space<vmem>>, vector<1x32x256xf32>,
    return
  }
  func.func @transform_0(%arg0: i32) -> (i32, i32) {
    %c0_i32 = arith.constant 0 : i32
    %c0_i32_0 = arith.constant 0 : i32
    return %c0_i32, %arg0 : i32, i32
  }
  func.func @transform_1(%arg0: i32) -> (i32, i32) {
    %c0_i32 = arith.constant 0 : i32
    %c0_i32_0 = arith.constant 0 : i32
    return %c0_i32, %arg0 : i32, i32
  }
  func.func @transform_2(%arg0: i32) -> (i32, i32) {
    %c0_i32 = arith.constant 0 : i32
    %c0_i32_0 = arith.constant 0 : i32
    %c0_i32_1 = arith.constant 0 : i32
    return %c0_i32, %c0_i32_0 : i32, i32
  }
  func.func @transform_3(%arg0: i32) -> (i32, i32) {
    %c0_i32 = arith.constant 0 : i32
    %c0_i32_0 = arith.constant 0 : i32
    %c0_i32_1 = arith.constant 0 : i32
    return %c0_i32, %c0_i32_0 : i32, i32
  }
  func.func @transform_4(%arg0: i32) -> (i32, i32) {
    %c0_i32 = arith.constant 0 : i32
    %c0_i32_0 = arith.constant 0 : i32
    %c0_i32_1 = arith.constant 0 : i32
    return %c0_i32, %c0_i32_0 : i32, i32
  }
  func.func @transform_5(%arg0: i32) -> (i32, i32) {
    %c0_i32 = arith.constant 0 : i32
    %c0_i32_0 = arith.constant 0 : i32
    %c0_i32_1 = arith.constant 0 : i32
    return %c0_i32, %c0_i32_0 : i32, i32
  }
  func.func @transform_6(%arg0: i32) -> (i32, i32) {
    %c0_i32 = arith.constant 0 : i32
    %c0_i32_0 = arith.constant 0 : i32
    %c0_i32_1 = arith.constant 0 : i32
    return %c0_i32, %c0_i32_0 : i32, i32
  }
  func.func @transform_7(%arg0: i32) -> (i32, i32) {
    %c0_i32 = arith.constant 0 : i32
    %c0_i32_0 = arith.constant 0 : i32
    %c0_i32_1 = arith.constant 0 : i32
    return %c0_i32, %c0_i32_0 : i32, i32
  }
  func.func @transform_8(%arg0: i32) -> (i32, i32) {
    %c0_i32 = arith.constant 0 : i32
    %c0_i32_0 = arith.constant 0 : i32
    %c0_i32_1 = arith.constant 0 : i32
    return %c0_i32, %c0_i32_0 : i32, i32
  }
  func.func @transform_9(%arg0: i32) -> (i32, i32, i32) {
    %c0_i32 = arith.constant 0 : i32
    %c0_i32_0 = arith.constant 0 : i32
    %c0_i32_1 = arith.constant 0 : i32
    return %arg0, %c0_i32, %c0_i32_0 : i32, i32, i32
  }
}

</mosaic_0001>

<bundles_post_ra>
// kernel: tpu_custom_call.1
= control target key start
LH: loop header
LB: loop body
LE: loop exit
PB: predicated region body
PF: predicated region fallthrough
CT: control target
= control target key end

     0   :  { %s2926_s0 = inlined_call_operand.hbm [shape: bf16[32,1024], index: 0, kind: input, shape index: {}]   ;;  %s2927_s1 = inlined_call_operand.hbm [shape: bf16[32,1024], index: 1, kind: input, shape index: {}]   ;;  %s2928_s2 = inlined_call_operand.hbm [shape: bf16[32,32], index: 2, kind: input, shape index: {}]   ;;  %s2929_s3 = inlined_call_operand.hbm [shape: f32[32,1], index: 3, kind: input, shape index: {}]   ;;  %s2930_s4 = inlined_call_operand.hbm [shape: f32[4,32], index: 4, kind: input, shape index: {}]   ;;  %s2931_s5 = inlined_call_operand.hbm [shape: f32[4,32], index: 5, kind: input, shape index: {}]   ;;  %s2932_s6 = inlined_call_operand.hbm [shape: f32[4,1], index: 6, kind: input, shape index: {}]   ;;  %s2933_s7 = inlined_call_operand.hbm [shape: f32[32,4], index: 7, kind: input, shape index: {}]   ;;  %s2934_s8 = inlined_call_operand.hbm [shape: f32[32,1], index: 8, kind: input, shape index: {}]   ;;  %s2935_s9 = inlined_call_operand.hbm [shape: f32[4,32,256], index: 9, kind: output, shape index: {}]  }
   0x1   :  { %2944 = sst [smem:[#allocation25_spill]] %s2926_s0 }
   0x2   :  { %2945 = sst [smem:[#allocation26_spill]] %s2928_s2 }
   0x3   :  { %2946 = sst [smem:[#allocation27_spill]] %s2929_s3 }
   0x4   :  { %2947 = sst [smem:[#allocation28_spill]] %s2930_s4 }
   0x5   :  { %2948 = sst [smem:[#allocation29_spill]] %s2931_s5 }
   0x6   :  { %2949 = sst [smem:[#allocation30_spill]] %s2932_s6 }
   0x7   :  { %2950 = sst [smem:[#allocation31_spill]] %s2935_s9 }
   0x8   :  { %14 = vsyncpa [#allocation3], 0 }
   0x9   :  { %16 = vsyncpa [#allocation3 + $0x1], 0 }
   0xa   :  { %17 = vsyncpa [#allocation6], 0 }
   0xb   :  { %19 = vsyncpa [#allocation6 + $0x1], 0 }
   0xc   :  { %20 = vsyncpa [#allocation9], 0 }
   0xd   :  { %21 = vsyncpa [#allocation12], 0 }
   0xe   :  { %22 = vsyncpa [#allocation15], 0 }
   0xf   :  { %23 = vsyncpa [#allocation4], 0 }
  0x10   :  { %25 = vsyncpa [#allocation4 + $0x1], 0  ;;  %s2249_s30 = smov 0   ;;  %s2251_s10 = smov 0  }
  0x11   :  { %s2253_s11 = smov 0   ;;  %s2255_s12 = smov 0  }
  0x12 LB: > { %s2174_s13 = smov [#allocation7]   ;;  %s2270_s15 = sadd.s32 4294967295, %s2172_s12   ;;  %s2172_s12 = sphi %s2255_s12, %s2984_s12   ;;  %s2168_s11 = sphi %s2253_s11, %s2983_s11   ;;  %s2164_s10 = sphi %s2251_s10, %s2982_s10   ;;  %s2160_s30 = sphi %s2249_s30, %s2981_s30  }
  0x13   : > { %s273_s14 = sshll.u32 %s2174_s13, 4  ;;  %p1533_p0 = scmp.ge.s32.totalorder %s2172_s12, 1  ;;  %s2275_s14 = int_to_ptr.vmem [resolvable:$true] %s273_s14 }
  0x14   : > { %p2937_p1 = scmp.eq.s32.totalorder %s2270_s15, 0  ;;  %p261_p2 = scmp.lt.s32.totalorder %s2172_s12, 3 }
  0x15   : > { %s2175_s17 = smov [#allocation8]   ;;  %s2176_s20 = smov [#allocation11]  }
  0x16   : > { %p2277_p3 = pnand %p1533_p0, %p261_p2  ;;  %s286_s18 = sshll.u32 %s2175_s17, 4  ;;  %s2290_s18 = int_to_ptr.vmem [resolvable:$true] %s286_s18 }
  0x17   : > { %s2292_s21 = sshll.u32 %s2176_s20, 4  ;;  %s2953_s2 = sld [smem:[#allocation26_spill]]  ;;  %s312_s21 = int_to_ptr.vmem [resolvable:$true] %s2292_s21 }
  0x18   : > { %s2951_s16 = scalar_select %p2277_p3, 1, 0 }
  0x19   : > { %p1693_p5 = pneg %p2277_p3 }
  0x1b   : > { %p2286_p6 = pnand %p1693_p5, %p2937_p1 }
  0x1d   : > { %s1830_s24 = scalar_lea.hbm %s2953_s2, 256  ;;  %p2302_p8 = pneg %p2286_p6 }
  0x1e   : > { %p1831_p7 = scmp.ne.s32.totalorder %s2953_s2, %s1830_s24  ;;  %p1837_p11 = scmp.lt.u32.totalorder %s1830_s24, %s2953_s2 }
  0x20   : > { %p1833_p9 = pnand %p2302_p8, %p1831_p7 }
  0x22   : > { %p1834_p10 = pneg %p1833_p9 }
  0x24   : > { %p1839_p12 = pnand %p1837_p11, %p1834_p10 }
  0x26   : > { %1842 = shalt.err (!%p1839_p12)
}
  0x27   : > { %s1843_s13 = scalar_lea.vmem %s2275_s14, 256  ;;  %p1851_p5 = scmp.lt.s32.totalorder %s2275_s14, %s2275_s14 }
  0x28   : > { %p1844_p13 = scmp.ne.s32.totalorder %s2275_s14, %s1843_s13  ;;  %p1852_p4 = scmp.lt.s32.totalorder %s1843_s13, %s1843_s13 }
  0x2a   : > { %p1846_p0 = pnand %p1844_p13, %p2302_p8  ;;  %p1853_p7 = por %p1852_p4, %p1851_p5 }
  0x2c   : > { %p1847_p2 = pneg %p1846_p0 }
  0x2e   : > { %p1854_p9 = pnand %p1853_p7, %p1847_p2 }
  0x30   : > { %1857 = shalt.err (!%p1854_p9)
}
  0x31   : > { %s2177_s17 = smov 64   ;;  %s2178_s20 = smov 4  }
  0x32   : > { %1696 = dma.hbm_to_vmem [thread:$0]  (!%p2286_p6), %s2953_s2, 256, %s2275_s14, [#allocation6], %s2177_s17, %s2177_s17, %s2178_s20  }
  0x33   : > { %s2955_s3 = sld [smem:[#allocation27_spill]] }
  0x39   : > { %s1858_s26 = scalar_lea.hbm %s2955_s3, 512 }
  0x3a   : > { %p1859_p4 = scmp.ne.s32.totalorder %s2955_s3, %s1858_s26  ;;  %p1865_p12 = scmp.lt.u32.totalorder %s1858_s26, %s2955_s3 }
  0x3c   : > { %p1861_p10 = pnand %p1859_p4, %p2302_p8 }
  0x3e   : > { %p1862_p11 = pneg %p1861_p10 }
  0x40   : > { %p1867_p13 = pnand %p1865_p12, %p1862_p11 }
  0x42   : > { %1870 = shalt.err (!%p1867_p13)
}
  0x43   : > { %s1871_s14 = scalar_lea.vmem %s2290_s18, 512  ;;  %p1879_p7 = scmp.lt.s32.totalorder %s2290_s18, %s2290_s18 }
  0x44   : > { %p1872_p0 = scmp.ne.s32.totalorder %s2290_s18, %s1871_s14  ;;  %p1880_p9 = scmp.lt.s32.totalorder %s1871_s14, %s1871_s14 }
  0x46   : > { %p1874_p2 = pnand %p1872_p0, %p2302_p8  ;;  %p1881_p4 = por %p1880_p9, %p1879_p7 }
  0x48   : > { %p1875_p5 = pneg %p1874_p2 }
  0x4a   : > { %p1882_p10 = pnand %p1881_p4, %p1875_p5 }
  0x4c   : > { %1885 = shalt.err (!%p1882_p10)
}
  0x4d   : > { %s2939_s17 = smov 128   ;;  %s2941_s9 = smov 8  }
  0x4e   : > { %1699 = dma.hbm_to_vmem [thread:$0]  (!%p2286_p6), %s2955_s3, 512, %s2290_s18, [#allocation9], %s2939_s17, %s2939_s17, %s2941_s9  }
  0x4f   : > { %s2956_s5 = sld [smem:[#allocation29_spill]] }
  0x55   : > { %s1886_s25 = scalar_lea.hbm %s2956_s5, 64 }
  0x56   : > { %p1887_p11 = scmp.ne.s32.totalorder %s2956_s5, %s1886_s25  ;;  %p1893_p0 = scmp.lt.u32.totalorder %s1886_s25, %s2956_s5 }
  0x58   : > { %p1889_p12 = pnand %p1887_p11, %p2302_p8 }
  0x5a   : > { %p1890_p13 = pneg %p1889_p12 }
  0x5c   : > { %p1895_p2 = pnand %p1893_p0, %p1890_p13 }
  0x5e   : > { %1898 = shalt.err (!%p1895_p2)
}
  0x5f   : > { %s1899_s14 = scalar_lea.vmem %s312_s21, 64  ;;  %p1907_p4 = scmp.lt.s32.totalorder %s312_s21, %s312_s21 }
  0x60   : > { %p1900_p5 = scmp.ne.s32.totalorder %s312_s21, %s1899_s14  ;;  %p1908_p10 = scmp.lt.s32.totalorder %s1899_s14, %s1899_s14 }
  0x62   : > { %p1902_p7 = pnand %p1900_p5, %p2302_p8  ;;  %p1909_p1 = por %p1908_p10, %p1907_p4 }
  0x64   : > { %p1903_p9 = pneg %p1902_p7 }
  0x66   : > { %p1910_p3 = pnand %p1909_p1, %p1903_p9 }
  0x68   : > { %1913 = shalt.err (!%p1910_p3)
}
  0x69   : > { %1705 = dma.hbm_to_vmem [thread:$0]  (!%p2286_p6), %s2956_s5, 64, %s312_s21, [#allocation12]  }
  0x6a   : > { %s2181_s22 = smov [#allocation14]   ;;  %s2182_s24 = smov [#allocation10]  }
  0x6b   : > { %s332_s23 = sshll.u32 %s2181_s22, 4  ;;  %s300_s25 = sshll.u32 %s2182_s24, 4  ;;  %s333_s23 = int_to_ptr.vmem [resolvable:$true] %s332_s23  ;;  %s301_s25 = int_to_ptr.vmem [resolvable:$true] %s300_s25 }
  0x6c   : > { %s1914_s29 = scalar_lea.hbm %s2933_s7, 512 }
  0x6d   : > { %p1915_p1 = scmp.ne.s32.totalorder %s2933_s7, %s1914_s29  ;;  %p1921_p12 = scmp.lt.u32.totalorder %s1914_s29, %s2933_s7 }
  0x6f   : > { %p1917_p3 = pnand %p1915_p1, %p2302_p8 }
  0x71   : > { %p1918_p11 = pneg %p1917_p3 }
  0x73   : > { %p1923_p13 = pnand %p1921_p12, %p1918_p11 }
  0x75   : > { %1926 = shalt.err (!%p1923_p13)
}
  0x76   : > { %s1927_s21 = scalar_lea.vmem %s333_s23, 512  ;;  %p1935_p7 = scmp.lt.s32.totalorder %s333_s23, %s333_s23 }
  0x77   : > { %p1928_p0 = scmp.ne.s32.totalorder %s333_s23, %s1927_s21  ;;  %p1936_p9 = scmp.lt.s32.totalorder %s1927_s21, %s1927_s21 }
  0x79   : > { %p1930_p2 = pnand %p1928_p0, %p2302_p8  ;;  %p1937_p4 = por %p1936_p9, %p1935_p7 }
  0x7b   : > { %p1931_p5 = pneg %p1930_p2 }
  0x7d   : > { %p1938_p10 = pnand %p1937_p4, %p1931_p5 }
  0x7f   : > { %1941 = shalt.err (!%p1938_p10)
}
  0x80   : > { %s2957_s20 = smov 128   ;;  %s2958_s4 = sld [smem:[#allocation28_spill]] }
  0x81   : > { %1711 = dma.hbm_to_vmem [thread:$0]  (!%p2286_p6), %s2933_s7, 512, %s333_s23, [#allocation15], %s2957_s20, %s2957_s20, %s2941_s9  }
  0x86   : > { %s1942_s28 = scalar_lea.hbm %s2958_s4, 64 }
  0x87   : > { %p1943_p1 = scmp.ne.s32.totalorder %s2958_s4, %s1942_s28  ;;  %p1949_p12 = scmp.lt.u32.totalorder %s1942_s28, %s2958_s4 }
  0x89   : > { %p1945_p3 = pnand %p1943_p1, %p2302_p8 }
  0x8b   : > { %p1946_p11 = pneg %p1945_p3 }
  0x8d   : > { %p1951_p13 = pnand %p1949_p12, %p1946_p11 }
  0x8f   : > { %1954 = shalt.err (!%p1951_p13)
}
  0x90   : > { %s1955_s21 = scalar_lea.vmem %s301_s25, 64  ;;  %p1963_p7 = scmp.lt.s32.totalorder %s301_s25, %s301_s25 }
  0x91   : > { %p1956_p0 = scmp.ne.s32.totalorder %s301_s25, %s1955_s21  ;;  %p1964_p9 = scmp.lt.s32.totalorder %s1955_s21, %s1955_s21 }
  0x93   : > { %p1958_p2 = pnand %p1956_p0, %p2302_p8  ;;  %p1965_p4 = por %p1964_p9, %p1963_p7 }
  0x95   : > { %p1959_p5 = pneg %p1958_p2 }
  0x97   : > { %p1966_p10 = pnand %p1965_p4, %p1959_p5 }
  0x99   : > { %1969 = shalt.err (!%p1966_p10)
}
  0x9a   : > { %1702 = dma.hbm_to_vmem [thread:$0]  (!%p2286_p6), %s2958_s4, 64, %s301_s25, [#allocation9]  }
  0x9b   : > { %s2183_s22 = smov [#allocation13]   ;;  %s2184_s26 = smov [#allocation16]  }
  0x9c   : > { %s322_s24 = sshll.u32 %s2183_s22, 4  ;;  %s345_s28 = sshll.u32 %s2184_s26, 4  ;;  %s323_s24 = int_to_ptr.vmem [resolvable:$true] %s322_s24  ;;  %s346_s28 = int_to_ptr.vmem [resolvable:$true] %s345_s28 }
  0x9d   : > { %s2959_s6 = sld [smem:[#allocation30_spill]] }
  0xa3   : > { %s1970_s14 = scalar_lea.hbm %s2959_s6, 64 }
  0xa4   : > { %p1971_p1 = scmp.ne.s32.totalorder %s2959_s6, %s1970_s14  ;;  %p1977_p12 = scmp.lt.u32.totalorder %s1970_s14, %s2959_s6 }
  0xa6   : > { %p1973_p3 = pnand %p1971_p1, %p2302_p8 }
  0xa8   : > { %p1974_p11 = pneg %p1973_p3 }
  0xaa   : > { %p1979_p13 = pnand %p1977_p12, %p1974_p11 }
  0xac   : > { %1982 = shalt.err (!%p1979_p13)
}
  0xad   : > { %s1983_s25 = scalar_lea.vmem %s323_s24, 64  ;;  %p1991_p7 = scmp.lt.s32.totalorder %s323_s24, %s323_s24 }
  0xae   : > { %p1984_p0 = scmp.ne.s32.totalorder %s323_s24, %s1983_s25  ;;  %p1992_p9 = scmp.lt.s32.totalorder %s1983_s25, %s1983_s25 }
  0xb0   : > { %p1986_p2 = pnand %p1984_p0, %p2302_p8  ;;  %p1993_p4 = por %p1992_p9, %p1991_p7 }
  0xb2   : > { %p1987_p5 = pneg %p1986_p2 }
  0xb4   : > { %p1994_p10 = pnand %p1993_p4, %p1987_p5 }
  0xb6   : > { %1997 = shalt.err (!%p1994_p10)
}
  0xb7   : > { %1708 = dma.hbm_to_vmem [thread:$0]  (!%p2286_p6), %s2959_s6, 64, %s323_s24, [#allocation12]  }
  0xb8   : > { %s1998_s29 = scalar_lea.hbm %s2934_s8, 512 }
  0xb9   : > { %p1999_p1 = scmp.ne.s32.totalorder %s2934_s8, %s1998_s29  ;;  %p2005_p12 = scmp.lt.u32.totalorder %s1998_s29, %s2934_s8 }
  0xbb   : > { %p2001_p3 = pnand %p1999_p1, %p2302_p8 }
  0xbd   : > { %p2002_p11 = pneg %p2001_p3 }
  0xbf   : > { %p2007_p13 = pnand %p2005_p12, %p2002_p11 }
  0xc1   : > { %2010 = shalt.err (!%p2007_p13)
}
  0xc2   : > { %s2011_s23 = scalar_lea.vmem %s346_s28, 512  ;;  %p2019_p7 = scmp.lt.s32.totalorder %s346_s28, %s346_s28 }
  0xc3   : > { %p2012_p0 = scmp.ne.s32.totalorder %s346_s28, %s2011_s23  ;;  %p2020_p9 = scmp.lt.s32.totalorder %s2011_s23, %s2011_s23 }
  0xc5   : > { %p2014_p2 = pnand %p2012_p0, %p2302_p8  ;;  %p2021_p4 = por %p2020_p9, %p2019_p7 }
  0xc7   : > { %p2015_p5 = pneg %p2014_p2 }
  0xc9   : > { %p2022_p10 = pnand %p2021_p4, %p2015_p5 }
  0xcb   : > { %2025 = shalt.err (!%p2022_p10)
}
  0xcc   : > { %s2960_s24 = smov 8   ;;  %s1532_s19 = sadd.s32 4294967294, %s2172_s12  }
  0xcd   : > { %1714 = dma.hbm_to_vmem [thread:$0]  (!%p2286_p6), %s2934_s8, 512, %s346_s28, [#allocation15], %s2957_s20, %s2957_s20, %s2960_s24  }
  0xce   : > { %s2448_s27 = sadd.s32 1, %s2172_s12   ;;  %s38_s22 = sadd.s32 1, %s2168_s11 }
  0xcf   : > { %s35_s9 = ssub.s32 %s2172_s12, %s2448_s27  ;;  %p45_p8 = scmp.ne.s32.totalorder %s2168_s11, %s2164_s10 }
  0xd0   : > { %p36_p1 = scmp.eq.s32.totalorder %s35_s9, 0  ;;  %p46_p3 = scmp.eq.s32.totalorder %s2172_s12, 0 }
  0xd1   : > { %p51_p11 = scmp.ne.s32.totalorder %s2164_s10, %s2160_s30  ;;  %p248_p12 = scmp.eq.s32.totalorder %s2270_s15, 1 }
  0xd2   : > { %s2460_s26 = scalar_select %p36_p1, %s2168_s11, %s38_s22  }
  0xd3   : > { %p47_p13 = por %p46_p3, %p45_p8  ;;  %p2961_p0 = scmp.eq.s32.totalorder %s2270_s15, 0 }
  0xd4   : > { %p2468_p6 = por %p248_p12, %p45_p8  ;;  %p254_p5 = scmp.eq.s32.totalorder %s1532_s19, 1 }
  0xd5   : > { %p2464_p2 = por %p2961_p0, %p51_p11  ;;  %p1733_p7 = scmp.lt.s32.totalorder %s2172_s12, 2 }
  0xd6   : > { %s2963_s28 = scalar_select %p2468_p6, 1, 0 }
  0xd7   : > { %s359_s29 = sand.u32 1, %s2168_s11   ;;  %p2474_p9 = por %p254_p5, %p51_p11 }
  0xd8   : > { %s2478_s14 = sshll.u32 %s359_s29, 6  ;;  %s2942_s18 = sshll.u32 %s2172_s12, 8 }
  0xd9   : > { %s2964_s13 = scalar_select %p2474_p9, 1, 0 }
  0xda   : > { %s2965_s0 = sld [smem:[#allocation25_spill]]  ;;  %s363_s25 = scalar_lea.vmem [#allocation2], %s2478_s14 }
  0xdb   : > { %s370_s17 = sshll.u32 %s363_s25, 4  ;;  %p2489_p4 = pnand %p1733_p7, %p47_p13  ;;  %s2493_s17 = int_to_ptr.vmem [resolvable:$true] %s370_s17 }
  0xdc   : > { %s2495_s22 = scalar_lea.sflag [#allocation3], %s359_s29 }
  0xdd   : > { %p2028_p8 = pneg %p2489_p4 }
  0xe0   : > { %s2486_s24 = scalar_lea.hbm %s2965_s0, %s2942_s18  ;;  %s2031_s25 = scalar_lea.hbm %s2965_s0, 2048 }
  0xe1   : > { %s2026_s9 = scalar_lea.hbm %s2486_s24, 1024  ;;  %p2032_p11 = scmp.lt.u32.totalorder %s2486_s24, %s2965_s0 }
  0xe2   : > { %p2027_p10 = scmp.ne.s32.totalorder %s2486_s24, %s2026_s9  ;;  %p2033_p12 = scmp.lt.u32.totalorder %s2031_s25, %s2026_s9 }
  0xe3   : > { %p2035_p0 = scmp.lt.u32.totalorder %s2026_s9, %s2486_s24 }
  0xe4   : > { %p2029_p1 = pnand %p2028_p8, %p2027_p10  ;;  %p2034_p13 = por %p2033_p12, %p2032_p11 }
  0xe6   : > { %p2030_p3 = pneg %p2029_p1  ;;  %p2036_p5 = por %p2035_p0, %p2034_p13 }
  0xe8   : > { %p2037_p7 = pnand %p2036_p5, %p2030_p3 }
  0xea   : > { %2040 = shalt.err (!%p2037_p7)
}
  0xeb   : > { %s2041_s29 = scalar_lea.vmem %s2493_s17, 1024  ;;  %s2185_s21 = smov [#allocation2]  }
  0xec   : > { %p2042_p10 = scmp.ne.s32.totalorder %s2493_s17, %s2041_s29  ;;  %s2046_s23 = sshll.u32 %s2185_s21, 4  ;;  %s2047_s23 = int_to_ptr.vmem [resolvable:$false] %s2046_s23 }
  0xed   : > { %s2048_s2 = scalar_lea.vmem %s2047_s23, 2048  ;;  %p2049_p6 = scmp.lt.s32.totalorder %s2493_s17, %s2047_s23 }
  0xee   : > { %p2044_p1 = pnand %p2042_p10, %p2028_p8  ;;  %p2050_p11 = scmp.lt.s32.totalorder %s2048_s2, %s2041_s29 }
  0xf0   : > { %p2045_p9 = pneg %p2044_p1  ;;  %p2051_p12 = por %p2050_p11, %p2049_p6 }
  0xf2   : > { %p2052_p13 = pnand %p2051_p12, %p2045_p9 }
  0xf4   : > { %2055 = shalt.err (!%p2052_p13)
}
  0xf5   : > { %s2186_s18 = smov 512   ;;  %s2187_s9 = smov 256  }
  0xf6   : > { %s2188_s25 = smov 16   ;;  %s2967_s29 = sshll.u32 %s2172_s12, 8 }
  0xf7   : > { %1718 = dma.hbm_to_vmem [thread:$0]  (!%p2489_p4), %s2486_s24, 1024, %s2493_s17, %s2495_s22, %s2186_s18, %s2187_s9, %s2188_s25  }
  0xf8   : > { %s2531_s2 = scalar_lea.hbm %s2927_s1, %s2967_s29  ;;  %s384_s0 = scalar_lea.vmem [#allocation5], %s2478_s14 }
  0xf9   : > { %s391_s3 = sshll.u32 %s384_s0, 4  ;;  %s380_s4 = sand.u32 1, %s2172_s12   ;;  %s2534_s3 = int_to_ptr.vmem [resolvable:$true] %s391_s3 }
  0xfa   : > { %s2537_s5 = scalar_lea.sflag [#allocation6], %s380_s4  ;;  %s2056_s6 = scalar_lea.hbm %s2531_s2, 1024 }
  0xfb   : > { %p2057_p6 = scmp.ne.s32.totalorder %s2531_s2, %s2056_s6  ;;  %s2061_s22 = scalar_lea.hbm %s2927_s1, 2048 }
  0xfc   : > { %p2062_p0 = scmp.lt.u32.totalorder %s2531_s2, %s2927_s1  ;;  %p2063_p5 = scmp.lt.u32.totalorder %s2061_s22, %s2056_s6 }
  0xfd   : > { %p2059_p9 = pnand %p2057_p6, %p2028_p8  ;;  %p2065_p10 = scmp.lt.u32.totalorder %s2056_s6, %s2531_s2 }
  0xfe   : > { %p2064_p7 = por %p2063_p5, %p2062_p0 }
  0xff   : > { %p2060_p3 = pneg %p2059_p9 }
 0x100   : > { %p2066_p1 = por %p2065_p10, %p2064_p7 }
 0x102   : > { %p2067_p11 = pnand %p2066_p1, %p2060_p3 }
 0x104   : > { %2070 = shalt.err (!%p2067_p11)
}
 0x105   : > { %s2071_s0 = scalar_lea.vmem %s2534_s3, 1024  ;;  %s2189_s4 = smov [#allocation5]  }
 0x106   : > { %p2072_p12 = scmp.ne.s32.totalorder %s2534_s3, %s2071_s0  ;;  %s2076_s14 = sshll.u32 %s2189_s4, 4  ;;  %s2077_s14 = int_to_ptr.vmem [resolvable:$false] %s2076_s14 }
 0x107   : > { %s2078_s23 = scalar_lea.vmem %s2077_s14, 2048  ;;  %p2079_p9 = scmp.lt.s32.totalorder %s2534_s3, %s2077_s14 }
 0x108   : > { %p2074_p13 = pnand %p2072_p12, %p2028_p8  ;;  %p2080_p0 = scmp.lt.s32.totalorder %s2078_s23, %s2071_s0 }
 0x10a   : > { %p2075_p6 = pneg %p2074_p13  ;;  %p2081_p5 = por %p2080_p0, %p2079_p9 }
 0x10c   : > { %p2082_p7 = pnand %p2081_p5, %p2075_p6 }
 0x10e   : > { %2085 = shalt.err (!%p2082_p7)
}
 0x10f   : > { %1721 = dma.hbm_to_vmem [thread:$0]  (!%p2489_p4), %s2531_s2, 1024, %s2534_s3, %s2537_s5, %s2186_s18, %s2187_s9, %s2188_s25  }
 0x110   : > { %p2968_p8 = scmp.ne.s32.totalorder %s2951_s16, 0 }
 0x111   : > { %s2569_s6 = sand.u32 (!%p2968_p8), 1, %s2164_s10  }
 0x112   : > { %403 = sbr.rel (%p2968_p8) target bundleno = 1255 (0x4e7), region = 56  ;;  %s1549_s24 = sshll.u32 (!%p2968_p8), %s2569_s6, 6 }
 0x113   : > { %s406_s17 = scalar_lea.sflag (!%p2968_p8), [#allocation3], %s2569_s6  ;;  %s2573_s22 = scalar_lea.vmem (!%p2968_p8), [#allocation2], %s1549_s24 }
 0x119   : > { %2131 = dma.done.wait (%p2464_p2), %s406_s17, 1024  }
 0x11a   : > { %2133 = vsyncadd (%p2464_p2), %s406_s17, 4294966272  ;;  %s414_s3 = sand.u32 1, %s2270_s15   ;;  %s2580_s16 = scalar_lea.vmem [#allocation5], %s1549_s24 }
 0x11b   : > { %s415_s5 = scalar_lea.sflag [#allocation6], %s414_s3 }
 0x11c   : > { %2135 = dma.done.wait (%p2464_p2), %s415_s5, 1024  }
 0x11d   : > { %2137 = vsyncadd (%p2464_p2), %s415_s5, 4294966272  ;;  %p2969_p4 = scmp.eq.s32.totalorder %s2270_s15, 0 }
 0x11f   : > { %2139 = dma.done.wait (%p2969_p4), [#allocation6], 256   ;;  %p2970_p3 = pmov %p2969_p4 }
 0x121   : > { %2141 = vsyncadd (%p2970_p3), [#allocation6], 4294967040  ;;  %p2971_p10 = pmov %p2970_p3 }
 0x122   : > { %p2972_p1 = pmov %p2970_p3 }
 0x123   : > { %2143 = dma.done.wait (%p2971_p10), [#allocation9], 576  }
 0x124   : > { %2145 = vsyncadd (%p2972_p1), [#allocation9], 4294966720  ;;  %p2973_p11 = pmov %p2972_p1 }
 0x125   : > { %p2974_p12 = pmov %p2972_p1 }
 0x126   : > { %2147 = dma.done.wait (%p2973_p11), [#allocation12], 128  }
 0x127   : > { %2149 = vsyncadd (%p2974_p12), [#allocation12], 4294967168  ;;  %p2975_p2 = pmov %p2972_p1 }
 0x128   : > { %p2976_p13 = pmov %p2972_p1 }
 0x129   : > { %2151 = dma.done.wait (%p2975_p2), [#allocation15], 1024  }
 0x12a   : > { %2153 = vsyncadd (%p2976_p13), [#allocation15], 4294966272  ;;  %v2603_v0 = vld [vmem:[%s2580_s16] sm:$0xff]  ;;  %v2607_v2 = vld [vmem:[%s2580_s16 + $0x10] sm:$0xff]  ;;  %vm2191_vm0 = vmmov 0   ;;  %vm650_vm1 = vcmask 7168  }
 0x12b   : > { %v490_v1 = vld [vmem:[%s2573_s22] sm:$0xff]  ;;  %v506_v3 = vunpack.c.l.bf16 %v2603_v0  ;;  %v507_v4 = vunpack.c.h.bf16 %v2603_v0  ;;  %v491_v7 = vld [vmem:[%s2573_s22 + $0x10] sm:$0xff]  ;;  %v571_v8 = vld [vmem:[%s2573_s22 + $0x18] sm:$0xff]  ;;  %v508_v9 = vunpack.c.l.bf16 %v2607_v2  ;;  %v509_v10 = vunpack.c.h.bf16 %v2607_v2  ;;  %s2194_s20 = smov 126   ;;  %s1558_s19 = sshll.u32 %s2569_s6, 7 }
 0x12c   : > { %v2611_v5 = vunpack.c.l.bf16 %v490_v1  ;;  %v2613_v6 = vunpack.c.h.bf16 %v490_v1  ;;  %v2619_v11 = vunpack.c.l.bf16 %v491_v7  ;;  %v2621_v12 = vunpack.c.h.bf16 %v491_v7  ;;  %v570_v13 = vld [vmem:[%s2573_s22 + $0x8] sm:$0xff]  ;;  %v2637_v22 = vld [vmem:[%s2580_s16 + $0x18] sm:$0xff]  ;;  %v493_v34 = vld [vmem:[%s2573_s22 + $0x30] sm:$0xff]  ;;  %s2831_s18 = scalar_lea.vmem [#allocation17], %s1558_s19  ;;  %s1601_s9 = sshll.u32 %s2270_s15, 11 }
 0x12d   : > { %v542_v14 = vadd.f32 %v507_v4, %v506_v3  ;;  %v2626_v16 = vunpack.c.l.bf16 %v571_v8  ;;  %v2628_v17 = vunpack.c.h.bf16 %v571_v8  ;;  %v545_v18 = vadd.f32 %v509_v10, %v508_v9  ;;  %v2640_v23 = vld [vmem:[%s2580_s16 + $0x8] sm:$0xff]  ;;  %v492_v35 = vld [vmem:[%s2573_s22 + $0x20] sm:$0xff]  ;;  %v2667_v42 = vld [vmem:[%s2580_s16 + $0x30] sm:$0xff]  ;;  %s1370_s25 = sshll.u32 %s2831_s18, 4  ;;  %s2977_s21 = sld [smem:[#allocation31_spill]]  ;;  %s2876_s25 = int_to_ptr.vmem [resolvable:$true] %s1370_s25 }
 0x12e   : > { %v514_v15 = vadd.f32 %v2613_v6, %v2611_v5  ;;  %v517_v19 = vadd.f32 %v2621_v12, %v2619_v11  ;;  %v2632_v20 = vunpack.c.l.bf16 %v570_v13  ;;  %v2634_v21 = vunpack.c.h.bf16 %v570_v13  ;;  %v2670_v43 = vld [vmem:[%s2580_s16 + $0x20] sm:$0xff]  ;;  %v573_v50 = vld [vmem:[%s2573_s22 + $0x38] sm:$0xff]  ;;  %v572_v51 = vld [vmem:[%s2573_s22 + $0x28] sm:$0xff]  ;;  %s1356_s0 = scalar_lea.sflag [#allocation4], %s2569_s6  ;;  %s2086_s4 = scalar_lea.vmem %s2876_s25, 2048 }
 0x12f   : > { %543 = vadd.xlane.f32.xlu1 %v542_v14  ;;  %v597_v24 = vadd.f32 %v2628_v17, %v2626_v16  ;;  %v588_v25 = vunpack.c.l.bf16 %v2637_v22  ;;  %v589_v27 = vunpack.c.h.bf16 %v2637_v22  ;;  %v586_v28 = vunpack.c.l.bf16 %v2640_v23  ;;  %v2695_v60 = vld [vmem:[%s2580_s16 + $0x38] sm:$0xff]  ;;  %v2698_v61 = vld [vmem:[%s2580_s16 + $0x28] sm:$0xff]  ;;  %p2087_p6 = scmp.ne.s32.totalorder %s2876_s25, %s2086_s4  ;;  %p2978_p9 = scmp.ne.s32.totalorder %s2963_s28, 0 }
 0x130   : > { %515 = vadd.xlane.f32.xlu0 %v514_v15  ;;  %v594_v26 = vadd.f32 %v2634_v21, %v2632_v20  ;;  %v587_v29 = vunpack.c.h.bf16 %v2640_v23  ;;  %v533_v32 = vmax.f32 %v2619_v11, %v2621_v12  ;;  %v530_v33 = vmax.f32 %v2611_v5, %v2613_v6  ;;  %s2196_s14 = smov [#allocation17]  }
 0x131   : > { %v625_v30 = vadd.f32 %v589_v27, %v588_v25  ;;  %v561_v36 = vmax.f32 %v508_v9, %v509_v10  ;;  %v558_v37 = vmax.f32 %v506_v3, %v507_v4  ;;  %v2658_v38 = vunpack.c.l.bf16 %v493_v34  ;;  %p2088_p0 = pnand %p2087_p6, %p2978_p9  ;;  %s2090_s23 = sshll.u32 %s2196_s14, 4  ;;  %s2091_s23 = int_to_ptr.vmem [resolvable:$false] %s2090_s23 }
 0x132   : > { %v622_v31 = vadd.f32 %v587_v29, %v586_v28  ;;  %v2660_v39 = vunpack.c.h.bf16 %v493_v34  ;;  %v2662_v40 = vunpack.c.l.bf16 %v492_v35  ;;  %v2664_v41 = vunpack.c.h.bf16 %v492_v35  ;;  %s2092_s24 = scalar_lea.vmem %s2091_s23, 4096  ;;  %p2093_p7 = scmp.lt.s32.totalorder %s2876_s25, %s2091_s23 }
 0x133   : > { %546 = vadd.xlane.f32.xlu1 %v545_v18  ;;  %v512_v44 = vunpack.c.l.bf16 %v2667_v42  ;;  %v513_v45 = vunpack.c.h.bf16 %v2667_v42  ;;  %v510_v48 = vunpack.c.l.bf16 %v2670_v43  ;;  %v511_v49 = vunpack.c.h.bf16 %v2670_v43  ;;  %s2874_s15 = scalar_lea.hbm %s2977_s21, %s1601_s9  ;;  %p2089_p5 = pneg %p2088_p0 }
 0x134   : > { %518 = vadd.xlane.f32.xlu0 %v517_v19  ;;  %v523_v46 = vadd.f32 %v2660_v39, %v2658_v38  ;;  %v520_v47 = vadd.f32 %v2664_v41, %v2662_v40  ;;  %v2682_v52 = vunpack.c.l.bf16 %v573_v50  ;;  %v2684_v53 = vunpack.c.h.bf16 %v573_v50  ;;  %p2094_p8 = scmp.lt.s32.totalorder %s2092_s24, %s2086_s4 }
 0x135   : > { %v551_v54 = vadd.f32 %v513_v45, %v512_v44  ;;  %v548_v55 = vadd.f32 %v511_v49, %v510_v48  ;;  %v2686_v56 = vunpack.c.l.bf16 %v572_v51  ;;  %v2688_v57 = vunpack.c.h.bf16 %v572_v51 }
 0x136   : > { %v603_v58 = vadd.f32 %v2684_v53, %v2682_v52  ;;  %v613_v62 = vmax.f32 %v2626_v16, %v2628_v17  ;;  %v610_v63 = vmax.f32 %v2632_v20, %v2634_v21  ;;  %v592_v1 = vunpack.c.l.bf16 %v2695_v60  ;;  %p2095_p4 = por %p2094_p8, %p2093_p7 }
 0x137   : > { %598 = vadd.xlane.f32.xlu1 %v597_v24  ;;  %v600_v59 = vadd.f32 %v2688_v57, %v2686_v56  ;;  %v593_v3 = vunpack.c.h.bf16 %v2695_v60  ;;  %v590_v4 = vunpack.c.l.bf16 %v2698_v61  ;;  %v591_v7 = vunpack.c.h.bf16 %v2698_v61 }
 0x138   : > { %595 = vadd.xlane.f32.xlu0 %v594_v26  ;;  %v641_v10 = vmax.f32 %v588_v25, %v589_v27  ;;  %v638_v13 = vmax.f32 %v586_v28, %v587_v29  ;;  %v539_v14 = vmax.f32 %v2658_v38, %v2660_v39  ;;  %v536_v15 = vmax.f32 %v2662_v40, %v2664_v41  ;;  %p2096_p3 = pnand %p2095_p4, %p2089_p5 }
 0x139   : > { %v631_v8 = vadd.f32 %v593_v3, %v592_v1  ;;  %v628_v9 = vadd.f32 %v591_v7, %v590_v4  ;;  %v567_v18 = vmax.f32 %v512_v44, %v513_v45  ;;  %v564_v19 = vmax.f32 %v510_v48, %v511_v49 }
 0x13a   : > { %v2190_v24 = vmov 0.0|0.0   ;;  %v619_v25 = vmax.f32 %v2682_v52, %v2684_v53  ;;  %v616_v26 = vmax.f32 %v2686_v56, %v2688_v57  ;;  %v647_v27 = vmax.f32 %v592_v1, %v593_v3 }
 0x13b   : > { %626 = vadd.xlane.f32.xlu1 %v625_v30  ;;  %1653 = vmatprep.subr.bf16.mxu1 %v2190_v24  ;;  %v644_v28 = vmax.f32 %v590_v4, %v591_v7  ;;  %v2192_v29 = vmov 0.0   ;;  %v2193_v30 = vmov 0   ;;  %vm655_vm2 = vcmask 15360  }
 0x13c   : > { %623 = vadd.xlane.f32.xlu0 %v622_v31  ;;  %1647 = vmatprep.subr.bf16.mxu0 %v2190_v24  ;;  %v826_v31 = vld [vmem:[#allocation13] sm:$0xf]  ;;  %vm660_vm3 = vcmask 23552   ;;  %vm679_vm4 = vcmask 261120   ;;  %vm838_vm5 = vcmask 31744   ;;  %vm851_vm6 = vcmask 1043456  }
 0x13d   : > { %1636 = vmatprep.mubr.msk.f32.mxu1 %vm2191_vm0, %v2192_v29  ;;  %1625 = vmatprep.mubr.msk.f32.mxu0 %vm2191_vm0, %v2192_v29 }
 0x13e   : > { %1796 = vset.pattern.permute.xlu0 %v2193_v30  ;;  %1797 = vset.pattern.permute.xlu1 %v2193_v30 }
 0x13f   : > { %534 = vmax.xlane.f32.xlu1 %v533_v32  ;;  %v1024_v32 = vld [vmem:[#allocation8] sm:$0xff] }
 0x140   : > { %531 = vmax.xlane.f32.xlu0 %v530_v33  ;;  %v1026_v33 = vld [vmem:[#allocation8 + $0x10] sm:$0xff] }
 0x143   : > { %562 = vmax.xlane.f32.xlu1 %v561_v36 }
 0x144   : > { %559 = vmax.xlane.f32.xlu0 %v558_v37 }
 0x147   : > { %524 = vadd.xlane.f32.xlu1 %v523_v46 }
 0x148   : > { %521 = vadd.xlane.f32.xlu0 %v520_v47 }
 0x14b   : > { %552 = vadd.xlane.f32.xlu1 %v551_v54 }
 0x14c   : > { %549 = vadd.xlane.f32.xlu0 %v548_v55 }
 0x14f   : > { %604 = vadd.xlane.f32.xlu1 %v603_v58 }
 0x150   : > { %601 = vadd.xlane.f32.xlu0 %v600_v59 }
 0x153   : > { %614 = vmax.xlane.f32.xlu1 %v613_v62 }
 0x154   : > { %611 = vmax.xlane.f32.xlu0 %v610_v63 }
 0x157   : > { %632 = vadd.xlane.f32.xlu1 %v631_v8 }
 0x158   : > { %629 = vadd.xlane.f32.xlu0 %v628_v9 }
 0x15b   : > { %642 = vmax.xlane.f32.xlu1 %v641_v10 }
 0x15c   : > { %639 = vmax.xlane.f32.xlu0 %v638_v13 }
 0x15f   : > { %540 = vmax.xlane.f32.xlu1 %v539_v14 }
 0x160   : > { %537 = vmax.xlane.f32.xlu0 %v536_v15 }
 0x163   : > { %568 = vmax.xlane.f32.xlu1 %v567_v18 }
 0x164   : > { %565 = vmax.xlane.f32.xlu0 %v564_v19 }
 0x167   : > { %620 = vmax.xlane.f32.xlu1 %v619_v25 }
 0x168   : > { %617 = vmax.xlane.f32.xlu0 %v616_v26 }
 0x16b   : > { %648 = vmax.xlane.f32.xlu1 %v647_v27 }
 0x16c   : > { %645 = vmax.xlane.f32.xlu0 %v644_v28 }
 0x182   : > { %829 = vperm.xlu0 %1796, %v826_v31  }
 0x186   : > { %1030 = vperm.xlu0 %1796, %v1024_v32  }
 0x18a   : > { %1040 = vperm.xlu0 %1796, %v1026_v33  }
 0x1bc   : > { %v544_v34 = vpop.xlane.xlu1 %543 }
 0x1bd   : > { %v516_v35 = vpop.xlane.xlu0 %515  ;;  %v554_v31 = vmul.f32 0.00390625, %v544_v34 }
 0x1be   : > { %v526_v4 = vmul.f32 0.00390625, %v516_v35 }
 0x1c0   : > { %v547_v36 = vpop.xlane.xlu1 %546 }
 0x1c1   : > { %v519_v37 = vpop.xlane.xlu0 %518  ;;  %v555_v32 = vmul.f32 0.00390625, %v547_v36 }
 0x1c2   : > { %v527_v7 = vmul.f32 0.00390625, %v519_v37 }
 0x1c4   : > { %v599_v44 = vpop.xlane.xlu1 %598 }
 0x1c5   : > { %v596_v45 = vpop.xlane.xlu0 %595  ;;  %v607_v62 = vmul.f32 0.00390625, %v599_v44 }
 0x1c6   : > { %v606_v63 = vmul.f32 0.00390625, %v596_v45 }
 0x1c7   : > { %v652_v8 = vsel %vm650_vm1, %v527_v7, %v607_v62 }
 0x1c8   : > { %v627_v46 = vpop.xlane.xlu1 %626  ;;  %v651_v9 = vsel %vm650_vm1, %v526_v4, %v606_v63 }
 0x1c9   : > { %v624_v47 = vpop.xlane.xlu0 %623  ;;  %v635_v26 = vmul.f32 0.00390625, %v627_v46 }
 0x1ca   : > { %v634_v27 = vmul.f32 0.00390625, %v624_v47 }
 0x1cb   : > { %v666_v33 = vsel %vm650_vm1, %v555_v32, %v635_v26 }
 0x1cc   : > { %v535_v48 = vpop.xlane.xlu1 %534  ;;  %v665_v35 = vsel %vm650_vm1, %v554_v31, %v634_v27 }
 0x1cd   : > { %v532_v49 = vpop.xlane.xlu0 %531  ;;  %v657_v10 = vsel %vm655_vm2, %v652_v8, %v535_v48 }
 0x1ce   : > { %v656_v13 = vsel %vm655_vm2, %v651_v9, %v532_v49 }
 0x1d0   : > { %v563_v50 = vpop.xlane.xlu1 %562 }
 0x1d1   : > { %v560_v51 = vpop.xlane.xlu0 %559  ;;  %v670_v37 = vsel %vm655_vm2, %v666_v33, %v563_v50 }
 0x1d2   : > { %v669_v44 = vsel %vm655_vm2, %v665_v35, %v560_v51 }
 0x1d4   : > { %v525_v54 = vpop.xlane.xlu1 %524 }
 0x1d5   : > { %v522_v55 = vpop.xlane.xlu0 %521  ;;  %v529_v8 = vmul.f32 0.00390625, %v525_v54 }
 0x1d6   : > { %v528_v50 = vmul.f32 0.00390625, %v522_v55 }
 0x1d8   : > { %v553_v58 = vpop.xlane.xlu1 %552 }
 0x1d9   : > { %v550_v59 = vpop.xlane.xlu0 %549 }
 0x1dc   : > { %v605_v1 = vpop.xlane.xlu1 %604 }
 0x1dd   : > { %v602_v3 = vpop.xlane.xlu0 %601  ;;  %v609_v36 = vmul.f32 0.00390625, %v605_v1  ;;  %v557_v1 = vmul.f32 0.00390625, %v553_v58  ;;  %v1572_v58 = vcombine.low %v2603_v0, %v2607_v2 }
 0x1de   : > { %v608_v63 = vmul.f32 0.00390625, %v602_v3  ;;  %v556_v3 = vmul.f32 0.00390625, %v550_v59  ;;  %v677_v59 = vld [vmem:[#allocation10] sm:$0xf] }
 0x1e0   : > { %v615_v14 = vpop.xlane.xlu1 %614 }
 0x1e1   : > { %v612_v15 = vpop.xlane.xlu0 %611  ;;  %v662_v18 = vsel %vm660_vm3, %v657_v10, %v615_v14  ;;  %v654_v10 = vsel %vm650_vm1, %v529_v8, %v609_v36  ;;  %v963_v36 = vld [vmem:[#allocation16 + $0x18] sm:$0xff] }
 0x1e2   : > { %v661_v19 = vsel %vm660_vm3, %v656_v13, %v612_v15  ;;  %v653_v13 = vsel %vm650_vm1, %v528_v50, %v608_v63  ;;  %v967_v63 = vmul.f32 2.0, %v963_v36 }
 0x1e3   : > { %v1654_v25 = vpack.c.bf16 %v662_v18, %v661_v19 }
 0x1e4   : > { %v633_v28 = vpop.xlane.xlu1 %632 }
 0x1e5   : > { %1655 = vmatpush3.bf16.msra.mxu1 %v1654_v25  ;;  %v630_v29 = vpop.xlane.xlu0 %629  ;;  %v637_v9 = vmul.f32 0.00390625, %v633_v28 }
 0x1e6   : > { %1656 = vmatprep.subr.bf16.mxu1 %v2190_v24  ;;  %v636_v51 = vmul.f32 0.00390625, %v630_v29 }
 0x1e7   : > { %v668_v26 = vsel %vm650_vm1, %v557_v1, %v637_v9  ;;  %v1574_v1 = vcombine.low %v2640_v23, %v2637_v22 }
 0x1e8   : > { %v643_v45 = vpop.xlane.xlu1 %642  ;;  %v667_v27 = vsel %vm650_vm1, %v556_v3, %v636_v51 }
 0x1e9   : > { %v640_v48 = vpop.xlane.xlu0 %639  ;;  %v674_v46 = vsel %vm660_vm3, %v670_v37, %v643_v45  ;;  %v1577_v37 = vcombine.high %v2670_v43, %v2667_v42  ;;  %v678_v45 = vld [vmem:[#allocation11] sm:$0xf] }
 0x1ea   : > { %v673_v47 = vsel %vm660_vm3, %v669_v44, %v640_v48  ;;  %v1576_v48 = vcombine.low %v2670_v43, %v2667_v42  ;;  %v961_v42 = vld [vmem:[#allocation16 + $0x8] sm:$0xff] }
 0x1eb   : > { %v1648_v49 = vpack.c.bf16 %v674_v46, %v673_v47  ;;  %v834_v46 = vld [vmem:[#allocation14] sm:$0xff] }
 0x1ec   : > { %v541_v62 = vpop.xlane.xlu1 %540  ;;  %v960_v47 = vld [vmem:[#allocation16] sm:$0xff] }
 0x1ed   : > { %1649 = vmatpush3.bf16.msra.mxu0 %v1648_v49  ;;  %v538_v34 = vpop.xlane.xlu0 %537  ;;  %v659_v14 = vsel %vm655_vm2, %v654_v10, %v541_v62  ;;  %v964_v43 = vmul.f32 2.0, %v960_v47  ;;  %v965_v49 = vmul.f32 2.0, %v961_v42  ;;  %v962_v62 = vld [vmem:[#allocation16 + $0x10] sm:$0xff] }
 0x1ee   : > { %1650 = vmatprep.subr.bf16.mxu0 %v2190_v24  ;;  %v658_v15 = vsel %vm655_vm2, %v653_v13, %v538_v34  ;;  %v1573_v24 = vcombine.high %v2603_v0, %v2607_v2  ;;  %v1808_v0 = vld [vmem:[#allocation7] sm:$0xff]   ;;  %v1809_v2 = vld [vmem:[#allocation7 + $0x8] sm:$0xff]   ;;  %v966_v34 = vmul.f32 2.0, %v962_v62 }
 0x1ef   : > { %970 = vperm.xlu1 %1797, %v964_v43  }
 0x1f0   : > { %v569_v4 = vpop.xlane.xlu1 %568 }
 0x1f1   : > { %v566_v7 = vpop.xlane.xlu0 %565  ;;  %v672_v28 = vsel %vm655_vm2, %v668_v26, %v569_v4  ;;  %v1578_v26 = vcombine.low %v2698_v61, %v2695_v60 }
 0x1f2   : > { %v671_v29 = vsel %vm655_vm2, %v667_v27, %v566_v7 }
 0x1f3   : > { %975 = vperm.xlu1 %1797, %v965_v49  }
 0x1f4   : > { %v621_v18 = vpop.xlane.xlu1 %620 }
 0x1f5   : > { %v618_v19 = vpop.xlane.xlu0 %617  ;;  %v664_v54 = vsel %vm660_vm3, %v659_v14, %v621_v18  ;;  %v1575_v18 = vcombine.high %v2640_v23, %v2637_v22 }
 0x1f6   : > { %v663_v55 = vsel %vm660_vm3, %v658_v15, %v618_v19  ;;  %v835_v19 = vld [vmem:[#allocation14 + $0x8] sm:$0xff] }
 0x1f7   : > { %v1657_v25 = vpack.c.bf16 %v664_v54, %v663_v55  ;;  %980 = vperm.xlu1 %1797, %v966_v34   ;;  %v836_v54 = vld [vmem:[#allocation14 + $0x10] sm:$0xff]  ;;  %v1579_v55 = vcombine.high %v2698_v61, %v2695_v60 }
 0x1f8   : > { %v649_v31 = vpop.xlane.xlu1 %648 }
 0x1f9   : > { %1658 = vmatpush3.bf16.msra.mxu1 %v1657_v25  ;;  %v646_v32 = vpop.xlane.xlu0 %645  ;;  %v676_v33 = vsel %vm660_vm3, %v672_v28, %v649_v31  ;;  %v837_v25 = vld [vmem:[#allocation14 + $0x18] sm:$0xff] }
 0x1fa   : > { %v675_v35 = vsel %vm660_vm3, %v671_v29, %v646_v32  ;;  %1104 = vmatprep.subr.bf16.mxu1 %v1573_v24 }
 0x1fb   : > { %v1651_v44 = vpack.c.bf16 %v676_v33, %v675_v35  ;;  %985 = vperm.xlu1 %1797, %v967_v63  }
 0x1fc   : > { %1637 = vmatmul.mubr.msk.f32.vlgmr.msra.gmra.mrb[0].mxu1 %vm679_vm4, %v677_v59  ;;  %v1025_v59 = vld [vmem:[#allocation8 + $0x8] sm:$0xff] }
 0x1fd   : > { %1652 = vmatpush3.bf16.msra.mxu0 %v1651_v44  ;;  %1105 = vmatpush1.bf16.msra.mxu1 %v1572_v58 }
 0x1fe   : > { %1106 = vmatprep.subr.bf16.mxu1 %v1577_v37  ;;  %1136 = vmatprep.mubr.bf16.mxu1 %v2193_v30  ;;  %v1027_v37 = vld [vmem:[#allocation8 + $0x18] sm:$0xff] }
 0x200   : > { %1626 = vmatmul.mubr.msk.f32.vlgmr.msra.gmra.mrb[0].mxu0 %vm679_vm4, %v678_v45 }
 0x201   : > { %1107 = vmatpush1.bf16.msra.mxu1 %v1576_v48  ;;  %1641 = vmatprep.mubr.msk.f32.mxu0 %vm838_vm5, %v834_v46  ;;  %v830_v51 = vpop.permute.xlu0 %829 }
 0x204   : > { %1580 = vmatmul.mubr.msk.bf16.vlgmr.msra.gmra.mrb[4].mxu1 %vm679_vm4, %v1808_v0 }
 0x205   : > { %1146 = vmatprep.mubr.bf16.mxu1 %v2193_v30 }
 0x20c   : > { %1581 = vmatmul.mubr.msk.bf16.gmra.mrb[8].mxu1 %vm679_vm4, %v1809_v2 }
 0x2cf   : > { %v822_v4 = vpop.f32.mrb[0].mxu1 }
 0x2d0   : > { %v1638_v7 = vpop.f32.mrb[1].mxu1 }
 0x2d3   : > { %v749_v8 = vpop.f32.mrb[0].mxu0 }
 0x2d4   : > { %v823_v50 = vadd.f32 %v822_v4, %v749_v8  ;;  %v1627_v9 = vpop.f32.mrb[1].mxu0 }
 0x2d6   : > { %v832_v10 = vadd.f32 %v830_v51, %v823_v50 }
 0x2d7   : > { %v2763_v13 = vpop.f32.mrb[4].mxu1 }
 0x2d8   : > { %v833_v14 = vmax.f32 %v832_v10, 0.0  ;;  %v2765_v15 = vpop.f32.mrb[5].mxu1 }
 0x2d9   : > { %v2769_v24 = vpop.f32.mrb[6].mxu1 }
 0x2da   : > { %1639 = vmatprep.subr.msk.mxu0 %vm851_vm6, %v833_v14  ;;  %v2773_v3 = vpop.f32.mrb[7].mxu1 }
 0x2db   : > { %1640 = vmatpush3.msk.msra.mxu0 %vm851_vm6, %v833_v14 }
 0x2dc   : > { %1642 = vmatmul.mubr.msk.f32.vlgmr.msra.gmra.mrb[2].mxu0 %vm838_vm5, %v835_v19  ;;  %1157 = vmatprep.subr.bf16.mxu0 %v1575_v18 }
 0x2dd   : > { %1158 = vmatpush1.bf16.msra.mxu0 %v1574_v1  ;;  %1644 = vmatprep.mubr.msk.f32.mxu0 %vm838_vm5, %v836_v54 }
 0x2de   : > { %1159 = vmatprep.subr.bf16.mxu0 %v1579_v55 }
 0x2df   : > { %v2781_v22 = vpop.f32.mrb[8].mxu1 }
 0x2e0   : > { %1645 = vmatmul.mubr.msk.f32.gmra.mrb[4].mxu0 %vm838_vm5, %v837_v25  ;;  %v2784_v23 = vpop.f32.mrb[9].mxu1 }
 0x2e1   : > { %1160 = vmatpush1.bf16.msra.mxu0 %v1578_v26  ;;  %1189 = vmatprep.mubr.bf16.mxu0 %v2193_v30  ;;  %v2802_v44 = vpop.f32.mrb[10].mxu1 }
 0x2e2   : > { %v2806_v48 = vpop.f32.mrb[11].mxu1 }
 0x2e4   : > { %1582 = vmatmul.mubr.msk.bf16.vlgmr.msra.gmra.mrb[8].mxu0 %vm679_vm4, %v1808_v0 }
 0x2e5   : > { %1199 = vmatprep.mubr.bf16.mxu0 %v2193_v30 }
 0x2ec   : > { %1583 = vmatmul.mubr.msk.bf16.gmra.mrb[12].mxu0 %vm679_vm4, %v1809_v2  ;;  %v971_v2 = vpop.permute.xlu1 %970 }
 0x2f0   : > { %v976_v46 = vpop.permute.xlu1 %975 }
 0x2f4   : > { %v981_v47 = vpop.permute.xlu1 %980 }
 0x2f8   : > { %v986_v42 = vpop.permute.xlu1 %985 }
 0x3af   : > { %v1643_v27 = vpop.f32.mrb[2].mxu0 }
 0x3b0   : > { %946 = vrot.lane.b32.xlu1 %v1643_v27, %s2194_s20  ;;  %v921_v60 = vpop.f32.mrb[3].mxu0 }
 0x3b3   : > { %v1646_v61 = vpop.f32.mrb[4].mxu0 }
 0x3b4   : > { %944 = vrot.lane.b32.xlu1 %v921_v60, %s2194_s20  ;;  %v931_v28 = vpop.f32.mrb[5].mxu0 }
 0x3b7   : > { %v2790_v29 = vpop.f32.mrb[8].mxu0 }
 0x3b8   : > { %948 = vrot.lane.b32.xlu1 %v931_v28, %s2194_s20  ;;  %v2792_v31 = vpop.f32.mrb[9].mxu0 }
 0x3b9   : > { %v2794_v32 = vpop.f32.mrb[10].mxu0 }
 0x3ba   : > { %v2796_v58 = vpop.f32.mrb[11].mxu0 }
 0x3bc   : > { %950 = vrot.lane.b32.xlu1 %v1646_v61, %s2194_s20 }
 0x3bf   : > { %v2798_v33 = vpop.f32.mrb[12].mxu0 }
 0x3c0   : > { %1035 = vperm.xlu1 %1797, %v1025_v59   ;;  %v2800_v35 = vpop.f32.mrb[13].mxu0 }
 0x3c1   : > { %v2804_v45 = vpop.f32.mrb[14].mxu0 }
 0x3c2   : > { %v2808_v0 = vpop.f32.mrb[15].mxu0 }
 0x3c4   : > { %1045 = vperm.xlu1 %1797, %v1027_v37  }
 0x422   : > { %v947_v43 = vpop.permute.xlu1 %946 }
 0x423   : > { %v957_v49 = vadd.f32 %v1643_v27, %v947_v43 }
 0x425   : > { %v989_v62 = vadd.f32 %v976_v46, %v957_v49 }
 0x426   : > { %v945_v34 = vpop.permute.xlu1 %944 }
 0x427   : > { %v1567_v36 = vmul.f32 -1.442695, %v989_v62  ;;  %v956_v63 = vadd.f32 %v945_v34, %v921_v60 }
 0x429   : > { %1814 = vpow2.f32 %v1567_v36  ;;  %v988_v4 = vadd.f32 %v971_v2, %v956_v63 }
 0x42a   : > { %v949_v7 = vpop.permute.xlu1 %948 }
 0x42b   : > { %v1566_v8 = vmul.f32 -1.442695, %v988_v4  ;;  %v958_v50 = vadd.f32 %v949_v7, %v931_v28 }
 0x42d   : > { %1816 = vpow2.f32 %v1566_v8  ;;  %v990_v9 = vadd.f32 %v981_v47, %v958_v50 }
 0x42e   : > { %v951_v51 = vpop.permute.xlu1 %950 }
 0x42f   : > { %v1568_v10 = vmul.f32 -1.442695, %v990_v9  ;;  %v959_v14 = vadd.f32 %v1646_v61, %v951_v51  ;;  %v2195_v61 = vmov 1  }
 0x431   : > { %v991_v18 = vadd.f32 %v986_v42, %v959_v14  ;;  %1818 = vpow2.f32 %v1568_v10  ;;  %v1031_v42 = vpop.permute.xlu0 %1030 }
 0x432   : > { %v1139_v43 = vadd.f32 %v2763_v13, %v1031_v42  ;;  %v1141_v49 = vadd.f32 %v2765_v15, %v1031_v42 }
 0x433   : > { %v1815_v19 = vpop.eup %1814  ;;  %v1569_v1 = vmul.f32 -1.442695, %v991_v18 }
 0x434   : > { %v1005_v54 = vadd.f32 1.0, %v1815_v19  ;;  %v1226_v36 = vmul.f32 0.1, %v1139_v43  ;;  %v1227_v63 = vmul.f32 0.1, %v1141_v49  ;;  %vm1210_vm7 = vcmp.gt.f32.partialorder %v1139_v43, 0.0 }
 0x435   : > { %1820 = vpow2.f32 %v1569_v1  ;;  %vm1211_vm8 = vcmp.gt.f32.partialorder %v1141_v49, 0.0  ;;  %v1041_v8 = vpop.permute.xlu0 %1040 }
 0x436   : > { %1822 = vrcp.f32 %v1005_v54  ;;  %v1149_v15 = vadd.f32 %v2781_v22, %v1041_v8  ;;  %v1242_v9 = vsel %vm1210_vm7, %v1139_v43, %v1226_v36  ;;  %v1151_v51 = vadd.f32 %v2784_v23, %v1041_v8 }
 0x437   : > { %v1817_v55 = vpop.eup %1816  ;;  %v1243_v19 = vsel %vm1211_vm8, %v1141_v49, %v1227_v63  ;;  %v1204_v36 = vadd.f32 %v2800_v35, %v1041_v8 }
 0x438   : > { %v1004_v25 = vadd.f32 1.0, %v1817_v55  ;;  %v1234_v55 = vmul.f32 0.1, %v1149_v15  ;;  %vm1218_vm13 = vcmp.gt.f32.partialorder %v1149_v15, 0.0  ;;  %vm1219_vm0 = vcmp.gt.f32.partialorder %v1151_v51, 0.0 }
 0x439   : > { %vm1221_vm4 = vcmp.gt.f32.partialorder %v1204_v36, 0.0 }
 0x43a   : > { %1824 = vrcp.f32 %v1004_v25 }
 0x43b   : > { %v1819_v26 = vpop.eup %1818 }
 0x43c   : > { %v1006_v59 = vadd.f32 1.0, %v1819_v26 }
 0x43f   : > { %v1821_v27 = vpop.eup %1820  ;;  %v1036_v47 = vpop.permute.xlu1 %1035 }
 0x440   : > { %v1823_v60 = vpop.eup %1822  ;;  %v1007_v28 = vadd.f32 1.0, %v1821_v27  ;;  %v1143_v62 = vadd.f32 %v2769_v24, %v1036_v47  ;;  %v1145_v34 = vadd.f32 %v2773_v3, %v1036_v47  ;;  %v1196_v50 = vadd.f32 %v2794_v32, %v1036_v47 }
 0x441   : > { %1265 = vperm.xlu1 %1797, %v1823_v60   ;;  %v1198_v13 = vadd.f32 %v2796_v58, %v1036_v47  ;;  %v1192_v24 = vadd.f32 %v2790_v29, %v1031_v42  ;;  %v1194_v3 = vadd.f32 %v2792_v31, %v1031_v42 }
 0x442   : > { %1826 = vrcp.f32 %v1007_v28  ;;  %v1231_v7 = vmul.f32 0.1, %v1145_v34  ;;  %vm1214_vm9 = vcmp.gt.f32.partialorder %v1143_v62, 0.0  ;;  %vm1215_vm10 = vcmp.gt.f32.partialorder %v1145_v34, 0.0 }
 0x443   : > { %1828 = vrcp.f32 %v1006_v59  ;;  %v2816_v4 = vpop.permute.xlu1 %1045  ;;  %v1232_v54 = vmul.f32 0.1, %v1196_v50  ;;  %v1233_v58 = vmul.f32 0.1, %v1198_v13  ;;  %vm1216_vm11 = vcmp.gt.f32.partialorder %v1196_v50, 0.0 }
 0x444   : > { %v1825_v37 = vpop.eup %1824  ;;  %v1247_v14 = vsel %vm1215_vm10, %v1145_v34, %v1231_v7  ;;  %vm1217_vm12 = vcmp.gt.f32.partialorder %v1198_v13, 0.0  ;;  %v1228_v22 = vmul.f32 0.1, %v1192_v24  ;;  %v1229_v29 = vmul.f32 0.1, %v1194_v3 }
 0x445   : > { %1260 = vperm.xlu0 %1796, %v1825_v37   ;;  %1798 = vset.pattern.permute.xlu1 %v2195_v61  ;;  %v1153_v23 = vadd.f32 %v2802_v44, %v2816_v4  ;;  %v1155_v26 = vadd.f32 %v2806_v48, %v2816_v4  ;;  %vm1212_vm14 = vcmp.gt.f32.partialorder %v1192_v24, 0.0  ;;  %vm1213_vm15 = vcmp.gt.f32.partialorder %v1194_v3, 0.0 }
 0x446   : > { %1319 = vperm.xlu1 %1798, %v1823_v60   ;;  %v1249_v44 = vsel %vm1217_vm12, %v1198_v13, %v1233_v58  ;;  %v1235_v28 = vmul.f32 0.1, %v1151_v51  ;;  %v1245_v47 = vsel %vm1213_vm15, %v1194_v3, %v1229_v29  ;;  %v1202_v34 = vadd.f32 %v2798_v33, %v1041_v8 }
 0x447   : > { %v1238_v49 = vmul.f32 0.1, %v1153_v23  ;;  %vm1222_vm1 = vcmp.gt.f32.partialorder %v1153_v23, 0.0  ;;  %vm1223_vm2 = vcmp.gt.f32.partialorder %v1155_v26, 0.0  ;;  %v1208_v63 = vadd.f32 %v2808_v0, %v2816_v4 }
 0x448   : > { %v1250_v33 = vsel %vm1218_vm13, %v1149_v15, %v1234_v55  ;;  %v1251_v35 = vsel %vm1219_vm0, %v1151_v51, %v1235_v28  ;;  %v1236_v13 = vmul.f32 0.1, %v1202_v34  ;;  %vm1220_vm3 = vcmp.gt.f32.partialorder %v1202_v34, 0.0 }
 0x449   : > { %1799 = vset.pattern.permute.xlu0 %v2195_v61  ;;  %v1254_v8 = vsel %vm1222_vm1, %v1153_v23, %v1238_v49  ;;  %v1241_v3 = vmul.f32 0.1, %v1208_v63  ;;  %vm1225_vm6 = vcmp.gt.f32.partialorder %v1208_v63, 0.0 }
 0x44a   : > { %1315 = vperm.xlu0 %1799, %v1825_v37   ;;  %1800 = vset.pattern.permute.xlu1 %v2193_v30 }
 0x44b   : > { %v1257_v58 = vsel %vm1225_vm6, %v1208_v63, %v1241_v3 }
 0x44c   : > { %v1827_v2 = vpop.eup %1826 }
 0x44d   : > { %1275 = vperm.xlu1 %1800, %v1827_v2   ;;  %v1829_v46 = vpop.eup %1828 }
 0x44e   : > { %1801 = vset.pattern.permute.xlu0 %v2193_v30  ;;  %v1230_v30 = vmul.f32 0.1, %v1143_v62 }
 0x44f   : > { %1270 = vperm.xlu0 %1801, %v1829_v46  }
 0x450   : > { %v1246_v10 = vsel %vm1214_vm9, %v1143_v62, %v1230_v30  ;;  %v1239_v62 = vmul.f32 0.1, %v1155_v26 }
 0x451   : > { %1802 = vset.pattern.permute.xlu1 %v2195_v61 }
 0x452   : > { %1323 = vperm.xlu1 %1802, %v1829_v46   ;;  %v1244_v46 = vsel %vm1212_vm14, %v1192_v24, %v1228_v22  ;;  %v1237_v24 = vmul.f32 0.1, %v1204_v36 }
 0x453   : > { %1803 = vset.pattern.permute.xlu0 %v2195_v61 }
 0x454   : > { %1327 = vperm.xlu0 %1803, %v1827_v2  }
 0x4c0   : > { %v1266_v18 = vpop.permute.xlu1 %1265 }
 0x4c1   : > { %v1280_v1 = vmul.f32 %v1266_v18, %v1246_v10  ;;  %v1281_v32 = vmul.f32 %v1266_v18, %v1247_v14 }
 0x4c3   : > { %v1288_v31 = vadd.f32 %v1280_v1, %v2619_v11  ;;  %v1289_v25 = vadd.f32 %v1281_v32, %v2621_v12  ;;  %v1248_v12 = vsel %vm1216_vm11, %v1196_v50, %v1232_v54  ;;  %v1255_v50 = vsel %vm1223_vm2, %v1155_v26, %v1239_v62 }
 0x4c4   : > { %v1261_v27 = vpop.permute.xlu0 %1260  ;;  %v1252_v1 = vsel %vm1220_vm3, %v1202_v34, %v1236_v13  ;;  %v1253_v32 = vsel %vm1221_vm4, %v1204_v36, %v1237_v24 }
 0x4c5   : > { %1296 = vst [vmem:[%s2831_s18 + $0x10] sm:$0xff] %v1288_v31  ;;  %1297 = vst [vmem:[%s2831_s18 + $0x18] sm:$0xff] %v1289_v25  ;;  %v1278_v60 = vmul.f32 %v1261_v27, %v1242_v9  ;;  %v1279_v59 = vmul.f32 %v1261_v27, %v1243_v19  ;;  %v1320_v11 = vpop.permute.xlu1 %1319 }
 0x4c6   : > { %v1332_v48 = vmul.f32 %v1320_v11, %v1248_v12  ;;  %v1333_v37 = vmul.f32 %v1320_v11, %v1249_v44 }
 0x4c7   : > { %v1286_v61 = vadd.f32 %v1278_v60, %v2611_v5  ;;  %v1287_v2 = vadd.f32 %v1279_v59, %v2613_v6  ;;  %v1206_v6 = vadd.f32 %v2804_v45, %v2816_v4 }
 0x4c8   : > { %v1340_v42 = vadd.f32 %v1332_v48, %v2626_v16  ;;  %v1341_v43 = vadd.f32 %v1333_v37, %v2628_v17 }
 0x4c9   : > { %1294 = vst [vmem:[%s2831_s18] sm:$0xff] %v1286_v61  ;;  %1295 = vst [vmem:[%s2831_s18 + $0x8] sm:$0xff] %v1287_v2  ;;  %v1316_v5 = vpop.permute.xlu0 %1315  ;;  %v1240_v15 = vmul.f32 0.1, %v1206_v6  ;;  %vm1224_vm5 = vcmp.gt.f32.partialorder %v1206_v6, 0.0 }
 0x4ca   : > { %1586 = vst [vmem:[%s2831_s18 + $0x50] sm:$0xff] %v1340_v42  ;;  %1587 = vst [vmem:[%s2831_s18 + $0x58] sm:$0xff] %v1341_v43  ;;  %v1330_v16 = vmul.f32 %v1316_v5, %v1244_v46  ;;  %v1331_v17 = vmul.f32 %v1316_v5, %v1245_v47 }
 0x4cc   : > { %v1338_v30 = vadd.f32 %v1330_v16, %v2632_v20  ;;  %v1339_v7 = vadd.f32 %v1331_v17, %v2634_v21  ;;  %v1276_v45 = vpop.permute.xlu1 %1275 }
 0x4cd   : > { %v1284_v0 = vmul.f32 %v1276_v45, %v1254_v8  ;;  %v1285_v4 = vmul.f32 %v1276_v45, %v1255_v50 }
 0x4ce   : > { %1584 = vst [vmem:[%s2831_s18 + $0x40] sm:$0xff] %v1338_v30  ;;  %1585 = vst [vmem:[%s2831_s18 + $0x48] sm:$0xff] %v1339_v7  ;;  %v1271_v9 = vpop.permute.xlu0 %1270 }
 0x4cf   : > { %v1292_v20 = vadd.f32 %v1284_v0, %v2658_v38  ;;  %v1293_v21 = vadd.f32 %v1285_v4, %v2660_v39  ;;  %v1282_v51 = vmul.f32 %v1271_v9, %v1250_v33  ;;  %v1283_v10 = vmul.f32 %v1271_v9, %v1251_v35 }
 0x4d0   : > { %v1256_v39 = vsel %vm1224_vm5, %v1206_v6, %v1240_v15 }
 0x4d1   : > { %1300 = vst [vmem:[%s2831_s18 + $0x30] sm:$0xff] %v1292_v20  ;;  %1301 = vst [vmem:[%s2831_s18 + $0x38] sm:$0xff] %v1293_v21  ;;  %v1290_v14 = vadd.f32 %v1282_v51, %v2662_v40  ;;  %v1291_v18 = vadd.f32 %v1283_v10, %v2664_v41  ;;  %v1324_v19 = vpop.permute.xlu1 %1323 }
 0x4d2   : > { %v1334_v38 = vmul.f32 %v1324_v19, %v1252_v1  ;;  %v1335_v54 = vmul.f32 %v1324_v19, %v1253_v32 }
 0x4d3   : > { %1298 = vst [vmem:[%s2831_s18 + $0x20] sm:$0xff] %v1290_v14  ;;  %1299 = vst [vmem:[%s2831_s18 + $0x28] sm:$0xff] %v1291_v18  ;;  %v1328_v55 = vpop.permute.xlu0 %1327 }
 0x4d4   : > { %v1342_v40 = vadd.f32 %v1334_v38, %v2686_v56  ;;  %v1343_v41 = vadd.f32 %v1335_v54, %v2688_v57  ;;  %v1336_v22 = vmul.f32 %v1328_v55, %v1256_v39  ;;  %v1337_v29 = vmul.f32 %v1328_v55, %v1257_v58 }
 0x4d6   : > { %1588 = vst [vmem:[%s2831_s18 + $0x60] sm:$0xff] %v1342_v40  ;;  %1589 = vst [vmem:[%s2831_s18 + $0x68] sm:$0xff] %v1343_v41  ;;  %v1344_v31 = vadd.f32 %v1336_v22, %v2682_v52  ;;  %v1345_v56 = vadd.f32 %v1337_v29, %v2684_v53 }
 0x4d8   : > { %1590 = vst [vmem:[%s2831_s18 + $0x70] sm:$0xff] %v1344_v31  ;;  %1591 = vst [vmem:[%s2831_s18 + $0x78] sm:$0xff] %v1345_v56 }
 0x4d9   : > { %2099 = shalt.err (!%p2096_p3)
}
 0x4da   : > { %s2100_s17 = scalar_lea.hbm %s2874_s15, 2048  ;;  %s2104_s5 = scalar_lea.hbm %s2977_s21, 4096 }
 0x4db   : > { %p2101_p10 = scmp.ne.s32.totalorder %s2874_s15, %s2100_s17  ;;  %p2105_p12 = scmp.lt.u32.totalorder %s2874_s15, %s2977_s21 }
 0x4dc   : > { %p2106_p2 = scmp.lt.u32.totalorder %s2104_s5, %s2100_s17  ;;  %p2108_p6 = scmp.lt.u32.totalorder %s2100_s17, %s2874_s15 }
 0x4dd   : > { %p2102_p1 = pnand %p2101_p10, %p2978_p9 }
 0x4de   : > { %p2107_p13 = por %p2106_p2, %p2105_p12 }
 0x4df   : > { %p2103_p11 = pneg %p2102_p1 }
 0x4e0   : > { %p2109_p0 = por %p2108_p6, %p2107_p13 }
 0x4e2   : > { %p2110_p5 = pnand %p2109_p0, %p2103_p11 }
 0x4e4   : > { %2113 = shalt.err (!%p2110_p5)
}
 0x4e5   : > { %s2197_s19 = smov 256   ;;  %s2198_s18 = smov 16  }
 0x4e6   : > { %1691 = dma.vmem_to_hbm [thread:$0]  (%p2978_p9), %s2876_s25, 2048, %s2874_s15, %s1356_s0, %s2197_s19, %s2197_s19, %s2198_s18  }
 0x4e7 PF: > { %s1385_s9 = sand.u32 1, %s2160_s30   ;;  %p2979_p7 = scmp.ne.s32.totalorder %s2964_s13, 0 }
 0x4e8   : > { %p2980_p8 = scmp.ge.s32.totalorder %s2172_s12, 2  ;;  %s1386_s2 = scalar_lea.sflag [#allocation4], %s1385_s9 }
 0x4ea   : > { %p1723_p4 = pnand %p2980_p8, %p2979_p7 }
 0x4ec   : > { %2155 = dma.done.wait (!%p1723_p4), %s1386_s2, 2048  }
 0x4ed   : > { %2157 = vsyncadd (!%p1723_p4), %s1386_s2, 4294965248  ;;  %p28_p3 = scmp.ge.s32.totalorder %s2448_s27, 4   ;;  %s2981_s30 = smov %s2164_s10 }
 0x4ee   : > { %s2982_s10 = smov %s2168_s11  ;;  %s2983_s11 = smov %s2460_s26 }
 0x4ef   : > { %s2984_s12 = smov %s2448_s27  ;;  %30 = sbr.rel (!%p28_p3) target bundleno = 18 (0x12), region = 143 }
 0x4f6   :  { %1391 = vsyncpa [#allocation3], 1 }
 0x4f7   :  { %1393 = vsyncpa [#allocation3 + $0x1], 1 }
 0x4f8   :  { %1394 = vsyncpa [#allocation6], 1 }
 0x4f9   :  { %1396 = vsyncpa [#allocation6 + $0x1], 1 }
 0x4fa   :  { %1397 = vsyncpa [#allocation9], 1 }
 0x4fb   :  { %1398 = vsyncpa [#allocation12], 1 }
 0x4fc   :  { %1399 = vsyncpa [#allocation15], 1 }
 0x4fd   :  { %1400 = vsyncpa [#allocation4], 1 }
 0x4fe   :  { %1402 = vsyncpa [#allocation4 + $0x1], 1 }

</bundles_post_ra>
